<compile_context>
chip_gen: v6e
topology: v6e:2x2x1
jax: 0.10.0
libtpu: 0.0.40
codegen_flags: <defaults>
</compile_context>

<pallas_src>
import jax
import jax.numpy as jnp
from jax.experimental import pallas as pl
from jax.experimental.pallas import tpu as pltpu


def lstm_kernel(x_ref,                       # (B*T, D)  batch-major rows (row b*T + t)
                wih0_ref,                    # (D, 4H)   bf16
                w0comb_ref,                  # (H, 8H)   bf16  [whh0^T | wih1^T]
                whh1_ref,                    # (H, 4H)   bf16
                b0_ref, b1_ref,              # (1, 4H)   f32   (b_ih + b_hh per layer)
                fcw_ref, fcb_ref,            # (H, O) bf16, (1, O) f32
                out_ref):                    # (B, O)    f32
    B, _ = out_ref.shape
    BT, _ = x_ref.shape
    T = BT // B
    H = whh1_ref.shape[0]
    G = 4 * H

    # --- Hoisted layer-0 input projection: one MXU push for all T steps ------
    # xproj[b, t, :] = x[b, t, :] @ W_ih0^T + (b_ih0 + b_hh0)
    x_bf = x_ref[...].astype(jnp.bfloat16)
    xproj = jnp.dot(x_bf, wih0_ref[...],
                    preferred_element_type=jnp.float32) + b0_ref[...]
    xproj = xproj.reshape(B, T, G)           # batch-major; [:, t, :] = step t rows

    w0comb = w0comb_ref[...]                 # (H, 8H) bf16
    whh1 = whh1_ref[...]                     # (H, 4H) bf16

    # Hoist bias broadcast once (outside the fully unrolled loop).
    b1b = jnp.broadcast_to(b1_ref[...], (B, G))

    def gates(pre):
        # 2 EUP pushes over the full (B, 4H) slab; 32-lane slices are static.
        sig = jax.nn.sigmoid(pre)
        th = jnp.tanh(pre)
        return sig[:, 0:H], sig[:, H:2 * H], th[:, 2 * H:3 * H], sig[:, 3 * H:4 * H]

    h1 = jnp.zeros((B, H), jnp.float32)
    c0 = jnp.zeros((B, H), jnp.float32)
    c1 = jnp.zeros((B, H), jnp.float32)
    # Layer-0 recurrent term for the *current* step; h0(-1) = 0 -> zeros,
    # so step 0 needs no layer-0 recurrent dot at all.
    rec0 = jnp.zeros((B, G), jnp.float32)

    # Fully unrolled time loop (T small & static) -> straight-line schedule.
    for t in range(T):
        # ---- layer-0 cell at step t (no dot on the critical path here) ------
        g0 = xproj[:, t, :] + rec0
        i0, f0, gg0, o0 = gates(g0)
        c0 = f0 * c0 + i0 * gg0
        h0 = o0 * jnp.tanh(c0)

        # ---- single combined MXU push on h0(t):
        #   lanes 0:4H  -> layer-0 recurrent gate term for step t+1
        #   lanes 4H:8H -> h0's contribution to layer-1 gates at step t
        comb = jnp.dot(h0.astype(jnp.bfloat16), w0comb,
                       preferred_element_type=jnp.float32)      # (B, 8H)
        rec0 = comb[:, 0:G]

        # ---- layer-1 cell at step t (h1 dot is off the h0 critical chain) ---
        g1 = comb[:, G:2 * G] + jnp.dot(h1.astype(jnp.bfloat16), whh1,
                                        preferred_element_type=jnp.float32) + b1b
        i1, f1, gg1, o1 = gates(g1)
        c1 = f1 * c1 + i1 * gg1
        h1 = o1 * jnp.tanh(c1)

    # ---- fc + sigmoid on the top-layer final hidden state --------------------
    logits = jnp.dot(h1.astype(jnp.bfloat16), fcw_ref[...],
                     preferred_element_type=jnp.float32) + fcb_ref[...]
    out_ref[...] = jax.nn.sigmoid(logits).astype(out_ref.dtype)


def lstm_model_forward(x, params, output_dim):
    """x: (B, T, D) float32 (batch_first). params: pre-transposed/fused weights."""
    B, T, D = x.shape
    H = params["whh1_t"].shape[0]
    G = 4 * H

    # Batch-major flatten: row b*T + t is x[b, t, :].  Pure metadata reshape
    # (no transpose / extra HBM round trip).
    x2d = x.reshape(B * T, D)

    full = lambda shp: pl.BlockSpec(shp, lambda _: (0,) * len(shp))

    return pl.pallas_call(
        lstm_kernel,
        out_shape=jax.ShapeDtypeStruct((B, output_dim), jnp.float32),
        grid=(1,),
        in_specs=[
            full((B * T, D)),
            full((D, G)),
            full((H, 2 * G)),
            full((H, G)),
            full((1, G)), full((1, G)),
            full((H, output_dim)), full((1, output_dim)),
        ],
        out_specs=full((B, output_dim)),
        compiler_params=pltpu.CompilerParams(
            dimension_semantics=("arbitrary",)),
    )(x2d,
      params["wih0_t"], params["w0comb"], params["whh1_t"],
      params["b0"], params["b1"],
      params["fcw_t"], params["fcb"])


def init_params(key, input_dim, hidden_dim, output_dim):
    """Deterministic synthetic init; shapes mirror nn.LSTM / nn.Linear.

    MXU-operand weights are stored in bf16 (halves weight DMA / vreg feed);
    biases stay f32 since they join f32 elementwise math.
    """
    ks = jax.random.split(key, 10)
    scale = 0.1

    def rnd(k, shp):
        return scale * jax.random.normal(k, shp, dtype=jnp.float32)

    H = hidden_dim
    # Layer 0: W_ih (4H, D), W_hh (4H, H), b_ih (4H,), b_hh (4H,)
    w_ih0 = rnd(ks[0], (4 * H, input_dim))
    w_hh0 = rnd(ks[1], (4 * H, H))
    b_ih0 = rnd(ks[2], (4 * H,))
    b_hh0 = rnd(ks[3], (4 * H,))
    # Layer 1
    w_ih1 = rnd(ks[4], (4 * H, H))
    w_hh1 = rnd(ks[5], (4 * H, H))
    b_ih1 = rnd(ks[6], (4 * H,))
    b_hh1 = rnd(ks[7], (4 * H,))
    # fc
    fc_w = rnd(ks[8], (output_dim, H))
    fc_b = rnd(ks[9], (output_dim,))

    bf = jnp.bfloat16
    return {
        "wih0_t": w_ih0.T.astype(bf),                                        # (D, 4H)
        # Combined h0 weight: cols 0:4H = W_hh0^T (layer-0 recurrence),
        #                     cols 4H:8H = W_ih1^T (layer-1 input from h0).
        "w0comb": jnp.concatenate([w_hh0.T, w_ih1.T], axis=1).astype(bf),    # (H, 8H)
        "whh1_t": w_hh1.T.astype(bf),                                        # (H, 4H)
        "b0": (b_ih0 + b_hh0)[None, :],                                      # (1, 4H) f32
        "b1": (b_ih1 + b_hh1)[None, :],                                      # (1, 4H) f32
        "fcw_t": fc_w.T.astype(bf),                                          # (H, O)
        "fcb": fc_b[None, :],                                                # (1, O) f32
    }


def reference_forward(x, params):
    """Pure-JAX reference (no Pallas), same math incl. bf16 MXU operands."""
    B, T, _ = x.shape
    H = params["whh1_t"].shape[0]
    G = 4 * H
    bf = jnp.bfloat16

    def dot(a, b):
        return jnp.dot(a.astype(bf), b.astype(bf),
                       preferred_element_type=jnp.float32)

    def split(g):
        return (jax.nn.sigmoid(g[:, 0:H]),
                jax.nn.sigmoid(g[:, H:2 * H]),
                jnp.tanh(g[:, 2 * H:3 * H]),
                jax.nn.sigmoid(g[:, 3 * H:4 * H]))

    whh0_t = params["w0comb"][:, :G]
    wih1_t = params["w0comb"][:, G:]

    h0 = c0 = h1 = c1 = jnp.zeros((B, H), jnp.float32)
    for t in range(T):
        g0 = dot(x[:, t, :], params["wih0_t"]) + dot(h0, whh0_t) + params["b0"]
        i, f, g, o = split(g0)
        c0 = f * c0 + i * g
        h0 = o * jnp.tanh(c0)

        g1 = dot(h0, wih1_t) + dot(h1, params["whh1_t"]) + params["b1"]
        i, f, g, o = split(g1)
        c1 = f * c1 + i * g
        h1 = o * jnp.tanh(c1)

    return jax.nn.sigmoid(dot(h1, params["fcw_t"]) + params["fcb"])


if __name__ == "__main__":
    # Shapes implied by the module: batch=2, seq=8, input_dim=8, hidden_dim=32,
    # num_layers=2, output_dim=4.
    B, T, D, H, O = 2, 8, 8, 32, 4

    key = jax.random.PRNGKey(0)
    kx, kp = jax.random.split(key)
    x = jax.random.normal(kx, (B, T, D), dtype=jnp.float32)
    params = init_params(kp, D, H, O)

    fwd = jax.jit(lambda xx, pp: lstm_model_forward(xx, pp, O))
    out = fwd(x, params)
    jax.block_until_ready(out)
    assert out.shape == (B, O)

    ref = reference_forward(x, params)
    # bf16 MXU operands in both paths; tolerance covers accumulation-order ulps.
    assert jnp.allclose(out, ref, atol=5e-3, rtol=5e-3), (out, ref)

    print("KERNEL_OK")
</pallas_src>

<mosaic_0001>
module attributes {stable_mosaic.version = 11 : i64} {
  func.func @lstm_kernel(%arg0: i32, %arg1: memref<16x8xf32, #tpu.memory_space<vmem>>, %arg2: memref<8x128xbf16, #tpu.memory_space<vmem>>, %arg3: memref<32x256xbf16, #tpu.memory_space<vmem>>, %arg4: memref<32x128xbf16, #tpu.memory_space<vmem>>, %arg5: memref<1x128xf32, #tpu.memory_space<vmem>>, %arg6: memref<1x128xf32, #tpu.memory_space<vmem>>, %arg7: memref<32x4xbf16, #tpu.memory_space<vmem>>, %arg8: memref<1x4xf32, #tpu.memory_space<vmem>>, %arg9: memref<2x4xf32, #tpu.memory_space<vmem>>) attributes {dimension_semantics = [#tpu.dimension_semantics<arbitrary>], iteration_bounds = array<i64: 1>, scalar_prefetch = 0 : i64, scratch_operands = 0 : i64, tpu.core_type = #tpu.core_type<tc>, window_params = [{pipeline_mode = #tpu.pipeline_mode<synchronous>, transform_indices = @transform_0, window_bounds = array<i64: 16, 8>}, {pipeline_mode = #tpu.pipeline_mode<synchronous>, transform_indices = @transform_1, window_bounds = array<i64: 8, 128>}, {pipeline_mode = #tpu.pipeline_mode<synchronous>, transform_indices = @transform_2, window_bounds = array<i64: 32, 256>}, {pipeline_mode = #tpu.pipeline_mode<synchronous>, transform_indices = @transform_3, window_bounds = array<i64: 32, 128>}, {pipeline_mode = #tpu.pipeline_mode<synchronous>, transform_indices = @transform_4, window_bounds = array<i64: 1, 128>}, {pipeline_mode = #tpu.pipeline_mode<synchronous>, transform_indices = @transform_5, window_bounds = array<i64: 1, 128>}, {pipeline_mode = #tpu.pipeline_mode<synchronous>, transform_indices = @transform_6, window_bounds = array<i64: 32, 4>}, {pipeline_mode = #tpu.pipeline_mode<synchronous>, transform_indices = @transform_7, window_bounds = array<i64: 1, 4>}, {pipeline_mode = #tpu.pipeline_mode<synchronous>, transform_indices = @transform_8, window_bounds = array<i64: 2, 4>}]} {
    %c0 = arith.constant 0 : index
    %c0_0 = arith.constant 0 : index
    %0 = vector.load %arg1[%c0, %c0_0] : memref<16x8xf32, #tpu.memory_space<vmem>>, vector<16x8xf32>
    %1 = arith.truncf %0 : vector<16x8xf32> to vector<16x8xbf16>
    %c0_1 = arith.constant 0 : index
    %c0_2 = arith.constant 0 : index
    %2 = vector.load %arg2[%c0_1, %c0_2] : memref<8x128xbf16, #tpu.memory_space<vmem>>, vector<8x128xbf16>
    %cst = arith.constant dense<0.000000e+00> : vector<16x128xf32>
    %3 = tpu.matmul %1, %2, %cst {dimension_numbers = #tpu.dot_dimension_numbers<[1], [0], [0], [1], [0, 0, 1, 1], [], []>} : vector<16x8xbf16>, vector<8x128xbf16>, vector<16x128xf32> -> vector<16x128xf32>
    %c0_3 = arith.constant 0 : index
    %c0_4 = arith.constant 0 : index
    %4 = vector.load %arg5[%c0_3, %c0_4] : memref<1x128xf32, #tpu.memory_space<vmem>>, vector<1x128xf32>
    %5 = vector.broadcast %4 : vector<1x128xf32> to vector<16x128xf32>
    %6 = arith.addf %3, %5 : vector<16x128xf32>
    %7 = vector.shape_cast %6 : vector<16x128xf32> to vector<2x8x128xf32>
    %c0_5 = arith.constant 0 : index
    %c0_6 = arith.constant 0 : index
    %8 = vector.load %arg3[%c0_5, %c0_6] : memref<32x256xbf16, #tpu.memory_space<vmem>>, vector<32x256xbf16>
    %c0_7 = arith.constant 0 : index
    %c0_8 = arith.constant 0 : index
    %9 = vector.load %arg4[%c0_7, %c0_8] : memref<32x128xbf16, #tpu.memory_space<vmem>>, vector<32x128xbf16>
    %c0_9 = arith.constant 0 : index
    %c0_10 = arith.constant 0 : index
    %10 = vector.load %arg6[%c0_9, %c0_10] : memref<1x128xf32, #tpu.memory_space<vmem>>, vector<1x128xf32>
    %11 = vector.shape_cast %10 : vector<1x128xf32> to vector<1x128xf32>
    %12 = vector.broadcast %11 : vector<1x128xf32> to vector<2x128xf32>
    %cst_11 = arith.constant 0.000000e+00 : f32
    %13 = vector.broadcast %cst_11 : f32 to vector<2x32xf32>
    %cst_12 = arith.constant 0.000000e+00 : f32
    %14 = vector.broadcast %cst_12 : f32 to vector<2x32xf32>
    %cst_13 = arith.constant 0.000000e+00 : f32
    %15 = vector.broadcast %cst_13 : f32 to vector<2x32xf32>
    %cst_14 = arith.constant 0.000000e+00 : f32
    %16 = vector.broadcast %cst_14 : f32 to vector<2x128xf32>
    %17 = vector.extract_strided_slice %7 {offsets = [0, 0, 0], sizes = [2, 1, 128], strides = [1, 1, 1]} : vector<2x8x128xf32> to vector<2x1x128xf32>
    %18 = vector.shape_cast %17 : vector<2x1x128xf32> to vector<2x128xf32>
    %19 = arith.addf %18, %16 : vector<2x128xf32>
    %20 = arith.negf %19 : vector<2x128xf32>
    %21 = math.exp %20 : vector<2x128xf32>
    %cst_15 = arith.constant 1.000000e+00 : f32
    %22 = vector.broadcast %cst_15 : f32 to vector<2x128xf32>
    %23 = arith.addf %22, %21 : vector<2x128xf32>
    %24 = arith.divf %22, %23 : vector<2x128xf32>
    %25 = math.tanh %19 : vector<2x128xf32>
    %26 = vector.extract_strided_slice %24 {offsets = [0, 0], sizes = [2, 32], strides = [1, 1]} : vector<2x128xf32> to vector<2x32xf32>
    %27 = vector.extract_strided_slice %24 {offsets = [0, 32], sizes = [2, 32], strides = [1, 1]} : vector<2x128xf32> to vector<2x32xf32>
    %28 = vector.extract_strided_slice %25 {offsets = [0, 64], sizes = [2, 32], strides = [1, 1]} : vector<2x128xf32> to vector<2x32xf32>
    %29 = vector.extract_strided_slice %24 {offsets = [0, 96], sizes = [2, 32], strides = [1, 1]} : vector<2x128xf32> to vector<2x32xf32>
    %30 = arith.mulf %27, %14 : vector<2x32xf32>
    %31 = arith.mulf %26, %28 : vector<2x32xf32>
    %32 = arith.addf %30, %31 : vector<2x32xf32>
    %33 = math.tanh %32 : vector<2x32xf32>
    %34 = arith.mulf %29, %33 : vector<2x32xf32>
    %35 = arith.truncf %34 : vector<2x32xf32> to vector<2x32xbf16>
    %cst_16 = arith.constant dense<0.000000e+00> : vector<2x256xf32>
    %36 = tpu.matmul %35, %8, %cst_16 {dimension_numbers = #tpu.dot_dimension_numbers<[1], [0], [0], [1], [0, 0, 1, 1], [], []>} : vector<2x32xbf16>, vector<32x256xbf16>, vector<2x256xf32> -> vector<2x256xf32>
    %37 = vector.extract_strided_slice %36 {offsets = [0, 0], sizes = [2, 128], strides = [1, 1]} : vector<2x256xf32> to vector<2x128xf32>
    %38 = vector.extract_strided_slice %36 {offsets = [0, 128], sizes = [2, 128], strides = [1, 1]} : vector<2x256xf32> to vector<2x128xf32>
    %39 = arith.truncf %13 : vector<2x32xf32> to vector<2x32xbf16>
    %cst_17 = arith.constant dense<0.000000e+00> : vector<2x128xf32>
    %40 = tpu.matmul %39, %9, %cst_17 {dimension_numbers = #tpu.dot_dimension_numbers<[1], [0], [0], [1], [0, 0, 1, 1], [], []>} : vector<2x32xbf16>, vector<32x128xbf16>, vector<2x128xf32> -> vector<2x128xf32>
    %41 = arith.addf %38, %40 : vector<2x128xf32>
    %42 = arith.addf %41, %12 : vector<2x128xf32>
    %43 = arith.negf %42 : vector<2x128xf32>
    %44 = math.exp %43 : vector<2x128xf32>
    %cst_18 = arith.constant 1.000000e+00 : f32
    %45 = vector.broadcast %cst_18 : f32 to vector<2x128xf32>
    %46 = arith.addf %45, %44 : vector<2x128xf32>
    %47 = arith.divf %45, %46 : vector<2x128xf32>
    %48 = math.tanh %42 : vector<2x128xf32>
    %49 = vector.extract_strided_slice %47 {offsets = [0, 0], sizes = [2, 32], strides = [1, 1]} : vector<2x128xf32> to vector<2x32xf32>
    %50 = vector.extract_strided_slice %47 {offsets = [0, 32], sizes = [2, 32], strides = [1, 1]} : vector<2x128xf32> to vector<2x32xf32>
    %51 = vector.extract_strided_slice %48 {offsets = [0, 64], sizes = [2, 32], strides = [1, 1]} : vector<2x128xf32> to vector<2x32xf32>
    %52 = vector.extract_strided_slice %47 {offsets = [0, 96], sizes = [2, 32], strides = [1, 1]} : vector<2x128xf32> to vector<2x32xf32>
    %53 = arith.mulf %50, %15 : vector<2x32xf32>
    %54 = arith.mulf %49, %51 : vector<2x32xf32>
    %55 = arith.addf %53, %54 : vector<2x32xf32>
    %56 = math.tanh %55 : vector<2x32xf32>
    %57 = arith.mulf %52, %56 : vector<2x32xf32>
    %58 = vector.extract_strided_slice %7 {offsets = [0, 1, 0], sizes = [2, 1, 128], strides = [1, 1, 1]} : vector<2x8x128xf32> to vector<2x1x128xf32>
    %59 = vector.shape_cast %58 : vector<2x1x128xf32> to vector<2x128xf32>
    %60 = arith.addf %59, %37 : vector<2x128xf32>
    %61 = arith.negf %60 : vector<2x128xf32>
    %62 = math.exp %61 : vector<2x128xf32>
    %cst_19 = arith.constant 1.000000e+00 : f32
    %63 = vector.broadcast %cst_19 : f32 to vector<2x128xf32>
    %64 = arith.addf %63, %62 : vector<2x128xf32>
    %65 = arith.divf %63, %64 : vector<2x128xf32>
    %66 = math.tanh %60 : vector<2x128xf32>
    %67 = vector.extract_strided_slice %65 {offsets = [0, 0], sizes = [2, 32], strides = [1, 1]} : vector<2x128xf32> to vector<2x32xf32>
    %68 = vector.extract_strided_slice %65 {offsets = [0, 32], sizes = [2, 32], strides = [1, 1]} : vector<2x128xf32> to vector<2x32xf32>
    %69 = vector.extract_strided_slice %66 {offsets = [0, 64], sizes = [2, 32], strides = [1, 1]} : vector<2x128xf32> to vector<2x32xf32>
    %70 = vector.extract_strided_slice %65 {offsets = [0, 96], sizes = [2, 32], strides = [1, 1]} : vector<2x128xf32> to vector<2x32xf32>
    %71 = arith.mulf %68, %32 : vector<2x32xf32>
    %72 = arith.mulf %67, %69 : vector<2x32xf32>
    %73 = arith.addf %71, %72 : vector<2x32xf32>
    %74 = math.tanh %73 : vector<2x32xf32>
    %75 = arith.mulf %70, %74 : vector<2x32xf32>
    %76 = arith.truncf %75 : vector<2x32xf32> to vector<2x32xbf16>
    %cst_20 = arith.constant dense<0.000000e+00> : vector<2x256xf32>
    %77 = tpu.matmul %76, %8, %cst_20 {dimension_numbers = #tpu.dot_dimension_numbers<[1], [0], [0], [1], [0, 0, 1, 1], [], []>} : vector<2x32xbf16>, vector<32x256xbf16>, vector<2x256xf32> -> vector<2x256xf32>
    %78 = vector.extract_strided_slice %77 {offsets = [0, 0], sizes = [2, 128], strides = [1, 1]} : vector<2x256xf32> to vector<2x128xf32>
    %79 = vector.extract_strided_slice %77 {offsets = [0, 128], sizes = [2, 128], strides = [1, 1]} : vector<2x256xf32> to vector<2x128xf32>
    %80 = arith.truncf %57 : vector<2x32xf32> to vector<2x32xbf16>
    %cst_21 = arith.constant dense<0.000000e+00> : vector<2x128xf32>
    %81 = tpu.matmul %80, %9, %cst_21 {dimension_numbers = #tpu.dot_dimension_numbers<[1], [0], [0], [1], [0, 0, 1, 1], [], []>} : vector<2x32xbf16>, vector<32x128xbf16>, vector<2x128xf32> -> vector<2x128xf32>
    %82 = arith.addf %79, %81 : vector<2x128xf32>
    %83 = arith.addf %82, %12 : vector<2x128xf32>
    %84 = arith.negf %83 : vector<2x128xf32>
    %85 = math.exp %84 : vector<2x128xf32>
    %cst_22 = arith.constant 1.000000e+00 : f32
    %86 = vector.broadcast %cst_22 : f32 to vector<2x128xf32>
    %87 = arith.addf %86, %85 : vector<2x128xf32>
    %88 = arith.divf %86, %87 : vector<2x128xf32>
    %89 = math.tanh %83 : vector<2x128xf32>
    %90 = vector.extract_strided_slice %88 {offsets = [0, 0], sizes = [2, 32], strides = [1, 1]} : vector<2x128xf32> to vector<2x32xf32>
    %91 = vector.extract_strided_slice %88 {offsets = [0, 32], sizes = [2, 32], strides = [1, 1]} : vector<2x128xf32> to vector<2x32xf32>
    %92 = vector.extract_strided_slice %89 {offsets = [0, 64], sizes = [2, 32], strides = [1, 1]} : vector<2x128xf32> to vector<2x32xf32>
    %93 = vector.extract_strided_slice %88 {offsets = [0, 96], sizes = [2, 32], strides = [1, 1]} : vector<2x128xf32> to vector<2x32xf32>
    %94 = arith.mulf %91, %55 : vector<2x32xf32>
    %95 = arith.mulf %90, %92 : vector<2x32xf32>
    %96 = arith.addf %94, %95 : vector<2x32xf32>
    %97 = math.tanh %96 : vector<2x32xf32>
    %98 = arith.mulf %93, %97 : vector<2x32xf32>
    %99 = vector.extract_strided_slice %7 {offsets = [0, 2, 0], sizes = [2, 1, 128], strides = [1, 1, 1]} : vector<2x8x128xf32> to vector<2x1x128xf32>
    %100 = vector.shape_cast %99 : vector<2x1x128xf32> to vector<2x128xf32>
    %101 = arith.addf %100, %78 : vector<2x128xf32>
    %102 = arith.negf %101 : vector<2x128xf32>
    %103 = math.exp %102 : vector<2x128xf32>
    %cst_23 = arith.constant 1.000000e+00 : f32
    %104 = vector.broadcast %cst_23 : f32 to vector<2x128xf32>
    %105 = arith.addf %104, %103 : vector<2x128xf32>
    %106 = arith.divf %104, %105 : vector<2x128xf32>
    %107 = math.tanh %101 : vector<2x128xf32>
    %108 = vector.extract_strided_slice %106 {offsets = [0, 0], sizes = [2, 32], strides = [1, 1]} : vector<2x128xf32> to vector<2x32xf32>
    %109 = vector.extract_strided_slice %106 {offsets = [0, 32], sizes = [2, 32], strides = [1, 1]} : vector<2x128xf32> to vector<2x32xf32>
    %110 = vector.extract_strided_slice %107 {offsets = [0, 64], sizes = [2, 32], strides = [1, 1]} : vector<2x128xf32> to vector<2x32xf32>
    %111 = vector.extract_strided_slice %106 {offsets = [0, 96], sizes = [2, 32], strides = [1, 1]} : vector<2x128xf32> to vector<2x32xf32>
    %112 = arith.mulf %109, %73 : vector<2x32xf32>
    %113 = arith.mulf %108, %110 : vector<2x32xf32>
    %114 = arith.addf %112, %113 : vector<2x32xf32>
    %115 = math.tanh %114 : vector<2x32xf32>
    %116 = arith.mulf %111, %115 : vector<2x32xf32>
    %117 = arith.truncf %116 : vector<2x32xf32> to vector<2x32xbf16>
    %cst_24 = arith.constant dense<0.000000e+00> : vector<2x256xf32>
    %118 = tpu.matmul %117, %8, %cst_24 {dimension_numbers = #tpu.dot_dimension_numbers<[1], [0], [0], [1], [0, 0, 1, 1], [], []>} : vector<2x32xbf16>, vector<32x256xbf16>, vector<2x256xf32> -> vector<2x256xf32>
    %119 = vector.extract_strided_slice %118 {offsets = [0, 0], sizes = [2, 128], strides = [1, 1]} : vector<2x256xf32> to vector<2x128xf32>
    %120 = vector.extract_strided_slice %118 {offsets = [0, 128], sizes = [2, 128], strides = [1, 1]} : vector<2x256xf32> to vector<2x128xf32>
    %121 = arith.truncf %98 : vector<2x32xf32> to vector<2x32xbf16>
    %cst_25 = arith.constant dense<0.000000e+00> : vector<2x128xf32>
    %122 = tpu.matmul %121, %9, %cst_25 {dimension_numbers = #tpu.dot_dimension_numbers<[1], [0], [0], [1], [0, 0, 1, 1], [], []>} : vector<2x32xbf16>, vector<32x128xbf16>, vector<2x128xf32> -> vector<2x128xf32>
    %123 = arith.addf %120, %122 : vector<2x128xf32>
    %124 = arith.addf %123, %12 : vector<2x128xf32>
    %125 = arith.negf %124 : vector<2x128xf32>
    %126 = math.exp %125 : vector<2x128xf32>
    %cst_26 = arith.constant 1.000000e+00 : f32
    %127 = vector.broadcast %cst_26 : f32 to vector<2x128xf32>
    %128 = arith.addf %127, %126 : vector<2x128xf32>
    %129 = arith.divf %127, %128 : vector<2x128xf32>
    %130 = math.tanh %124 : vector<2x128xf32>
    %131 = vector.extract_strided_slice %129 {offsets = [0, 0], sizes = [2, 32], strides = [1, 1]} : vector<2x128xf32> to vector<2x32xf32>
    %132 = vector.extract_strided_slice %129 {offsets = [0, 32], sizes = [2, 32], strides = [1, 1]} : vector<2x128xf32> to vector<2x32xf32>
    %133 = vector.extract_strided_slice %130 {offsets = [0, 64], sizes = [2, 32], strides = [1, 1]} : vector<2x128xf32> to vector<2x32xf32>
    %134 = vector.extract_strided_slice %129 {offsets = [0, 96], sizes = [2, 32], strides = [1, 1]} : vector<2x128xf32> to vector<2x32xf32>
    %135 = arith.mulf %132, %96 : vector<2x32xf32>
    %136 = arith.mulf %131, %133 : vector<2x32xf32>
    %137 = arith.addf %135, %136 : vector<2x32xf32>
    %138 = math.tanh %137 : vector<2x32xf32>
    %139 = arith.mulf %134, %138 : vector<2x32xf32>
    %140 = vector.extract_strided_slice %7 {offsets = [0, 3, 0], sizes = [2, 1, 128], strides = [1, 1, 1]} : vector<2x8x128xf32> to vector<2x1x128xf32>
    %141 = vector.shape_cast %140 : vector<2x1x128xf32> to vector<2x128xf32>
    %142 = arith.addf %141, %119 : vector<2x128xf32>
    %143 = arith.negf %142 : vector<2x128xf32>
    %144 = math.exp %143 : vector<2x128xf32>
    %cst_27 = arith.constant 1.000000e+00 : f32
    %145 = vector.broadcast %cst_27 : f32 to vector<2x128xf32>
    %146 = arith.addf %145, %144 : vector<2x128xf32>
    %147 = arith.divf %145, %146 : vector<2x128xf32>
    %148 = math.tanh %142 : vector<2x128xf32>
    %149 = vector.extract_strided_slice %147 {offsets = [0, 0], sizes = [2, 32], strides = [1, 1]} : vector<2x128xf32> to vector<2x32xf32>
    %150 = vector.extract_strided_slice %147 {offsets = [0, 32], sizes = [2, 32], strides = [1, 1]} : vector<2x128xf32> to vector<2x32xf32>
    %151 = vector.extract_strided_slice %148 {offsets = [0, 64], sizes = [2, 32], strides = [1, 1]} : vector<2x128xf32> to vector<2x32xf32>
    %152 = vector.extract_strided_slice %147 {offsets = [0, 96], sizes = [2, 32], strides = [1, 1]} : vector<2x128xf32> to vector<2x32xf32>
    %153 = arith.mulf %150, %114 : vector<2x32xf32>
    %154 = arith.mulf %149, %151 : vector<2x32xf32>
    %155 = arith.addf %153, %154 : vector<2x32xf32>
    %156 = math.tanh %155 : vector<2x32xf32>
    %157 = arith.mulf %152, %156 : vector<2x32xf32>
    %158 = arith.truncf %157 : vector<2x32xf32> to vector<2x32xbf16>
    %cst_28 = arith.constant dense<0.000000e+00> : vector<2x256xf32>
    %159 = tpu.matmul %158, %8, %cst_28 {dimension_numbers = #tpu.dot_dimension_numbers<[1], [0], [0], [1], [0, 0, 1, 1], [], []>} : vector<2x32xbf16>, vector<32x256xbf16>, vector<2x256xf32> -> vector<2x256xf32>
    %160 = vector.extract_strided_slice %159 {offsets = [0, 0], sizes = [2, 128], strides = [1, 1]} : vector<2x256xf32> to vector<2x128xf32>
    %161 = vector.extract_strided_slice %159 {offsets = [0, 128], sizes = [2, 128], strides = [1, 1]} : vector<2x256xf32> to vector<2x128xf32>
    %162 = arith.truncf %139 : vector<2x32xf32> to vector<2x32xbf16>
    %cst_29 = arith.constant dense<0.000000e+00> : vector<2x128xf32>
    %163 = tpu.matmul %162, %9, %cst_29 {dimension_numbers = #tpu.dot_dimension_numbers<[1], [0], [0], [1], [0, 0, 1, 1], [], []>} : vector<2x32xbf16>, vector<32x128xbf16>, vector<2x128xf32> -> vector<2x128xf32>
    %164 = arith.addf %161, %163 : vector<2x128xf32>
    %165 = arith.addf %164, %12 : vector<2x128xf32>
    %166 = arith.negf %165 : vector<2x128xf32>
    %167 = math.exp %166 : vector<2x128xf32>
    %cst_30 = arith.constant 1.000000e+00 : f32
    %168 = vector.broadcast %cst_30 : f32 to vector<2x128xf32>
    %169 = arith.addf %168, %167 : vector<2x128xf32>
    %170 = arith.divf %168, %169 : vector<2x128xf32>
    %171 = math.tanh %165 : vector<2x128xf32>
    %172 = vector.extract_strided_slice %170 {offsets = [0, 0], sizes = [2, 32], strides = [1, 1]} : vector<2x128xf32> to vector<2x32xf32>
    %173 = vector.extract_strided_slice %170 {offsets = [0, 32], sizes = [2, 32], strides = [1, 1]} : vector<2x128xf32> to vector<2x32xf32>
    %174 = vector.extract_strided_slice %171 {offsets = [0, 64], sizes = [2, 32], strides = [1, 1]} : vector<2x128xf32> to vector<2x32xf32>
    %175 = vector.extract_strided_slice %170 {offsets = [0, 96], sizes = [2, 32], strides = [1, 1]} : vector<2x128xf32> to vector<2x32xf32>
    %176 = arith.mulf %173, %137 : vector<2x32xf32>
    %177 = arith.mulf %172, %174 : vector<2x32xf32>
    %178 = arith.addf %176, %177 : vector<2x32xf32>
    %179 = math.tanh %178 : vector<2x32xf32>
    %180 = arith.mulf %175, %179 : vector<2x32xf32>
    %181 = vector.extract_strided_slice %7 {offsets = [0, 4, 0], sizes = [2, 1, 128], strides = [1, 1, 1]} : vector<2x8x128xf32> to vector<2x1x128xf32>
    %182 = vector.shape_cast %181 : vector<2x1x128xf32> to vector<2x128xf32>
    %183 = arith.addf %182, %160 : vector<2x128xf32>
    %184 = arith.negf %183 : vector<2x128xf32>
    %185 = math.exp %184 : vector<2x128xf32>
    %cst_31 = arith.constant 1.000000e+00 : f32
    %186 = vector.broadcast %cst_31 : f32 to vector<2x128xf32>
    %187 = arith.addf %186, %185 : vector<2x128xf32>
    %188 = arith.divf %186, %187 : vector<2x128xf32>
    %189 = math.tanh %183 : vector<2x128xf32>
    %190 = vector.extract_strided_slice %188 {offsets = [0, 0], sizes = [2, 32], strides = [1, 1]} : vector<2x128xf32> to vector<2x32xf32>
    %191 = vector.extract_strided_slice %188 {offsets = [0, 32], sizes = [2, 32], strides = [1, 1]} : vector<2x128xf32> to vector<2x32xf32>
    %192 = vector.extract_strided_slice %189 {offsets = [0, 64], sizes = [2, 32], strides = [1, 1]} : vector<2x128xf32> to vector<2x32xf32>
    %193 = vector.extract_strided_slice %188 {offsets = [0, 96], sizes = [2, 32], strides = [1, 1]} : vector<2x128xf32> to vector<2x32xf32>
    %194 = arith.mulf %191, %155 : vector<2x32xf32>
    %195 = arith.mulf %190, %192 : vector<2x32xf32>
    %196 = arith.addf %194, %195 : vector<2x32xf32>
    %197 = math.tanh %196 : vector<2x32xf32>
    %198 = arith.mulf %193, %197 : vector<2x32xf32>
    %199 = arith.truncf %198 : vector<2x32xf32> to vector<2x32xbf16>
    %cst_32 = arith.constant dense<0.000000e+00> : vector<2x256xf32>
    %200 = tpu.matmul %199, %8, %cst_32 {dimension_numbers = #tpu.dot_dimension_numbers<[1], [0], [0], [1], [0, 0, 1, 1], [], []>} : vector<2x32xbf16>, vector<32x256xbf16>, vector<2x256xf32> -> vector<2x256xf32>
    %201 = vector.extract_strided_slice %200 {offsets = [0, 0], sizes = [2, 128], strides = [1, 1]} : vector<2x256xf32> to vector<2x128xf32>
    %202 = vector.extract_strided_slice %200 {offsets = [0, 128], sizes = [2, 128], strides = [1, 1]} : vector<2x256xf32> to vector<2x128xf32>
    %203 = arith.truncf %180 : vector<2x32xf32> to vector<2x32xbf16>
    %cst_33 = arith.constant dense<0.000000e+00> : vector<2x128xf32>
    %204 = tpu.matmul %203, %9, %cst_33 {dimension_numbers = #tpu.dot_dimension_numbers<[1], [0], [0], [1], [0, 0, 1, 1], [], []>} : vector<2x32xbf16>, vector<32x128xbf16>, vector<2x128xf32> -> vector<2x128xf32>
    %205 = arith.addf %202, %204 : vector<2x128xf32>
    %206 = arith.addf %205, %12 : vector<2x128xf32>
    %207 = arith.negf %206 : vector<2x128xf32>
    %208 = math.exp %207 : vector<2x128xf32>
    %cst_34 = arith.constant 1.000000e+00 : f32
    %209 = vector.broadcast %cst_34 : f32 to vector<2x128xf32>
    %210 = arith.addf %209, %208 : vector<2x128xf32>
    %211 = arith.divf %209, %210 : vector<2x128xf32>
    %212 = math.tanh %206 : vector<2x128xf32>
    %213 = vector.extract_strided_slice %211 {offsets = [0, 0], sizes = [2, 32], strides = [1, 1]} : vector<2x128xf32> to vector<2x32xf32>
    %214 = vector.extract_strided_slice %211 {offsets = [0, 32], sizes = [2, 32], strides = [1, 1]} : vector<2x128xf32> to vector<2x32xf32>
    %215 = vector.extract_strided_slice %212 {offsets = [0, 64], sizes = [2, 32], strides = [1, 1]} : vector<2x128xf32> to vector<2x32xf32>
    %216 = vector.extract_strided_slice %211 {offsets = [0, 96], sizes = [2, 32], strides = [1, 1]} : vector<2x128xf32> to vector<2x32xf32>
    %217 = arith.mulf %214, %178 : vector<2x32xf32>
    %218 = arith.mulf %213, %215 : vector<2x32xf32>
    %219 = arith.addf %217, %218 : vector<2x32xf32>
    %220 = math.tanh %219 : vector<2x32xf32>
    %221 = arith.mulf %216, %220 : vector<2x32xf32>
    %222 = vector.extract_strided_slice %7 {offsets = [0, 5, 0], sizes = [2, 1, 128], strides = [1, 1, 1]} : vector<2x8x128xf32> to vector<2x1x128xf32>
    %223 = vector.shape_cast %222 : vector<2x1x128xf32> to vector<2x128xf32>
    %224 = arith.addf %223, %201 : vector<2x128xf32>
    %225 = arith.negf %224 : vector<2x128xf32>
    %226 = math.exp %225 : vector<2x128xf32>
    %cst_35 = arith.constant 1.000000e+00 : f32
    %227 = vector.broadcast %cst_35 : f32 to vector<2x128xf32>
    %228 = arith.addf %227, %226 : vector<2x128xf32>
    %229 = arith.divf %227, %228 : vector<2x128xf32>
    %230 = math.tanh %224 : vector<2x128xf32>
    %231 = vector.extract_strided_slice %229 {offsets = [0, 0], sizes = [2, 32], strides = [1, 1]} : vector<2x128xf32> to vector<2x32xf32>
    %232 = vector.extract_strided_slice %229 {offsets = [0, 32], sizes = [2, 32], strides = [1, 1]} : vector<2x128xf32> to vector<2x32xf32>
    %233 = vector.extract_strided_slice %230 {offsets = [0, 64], sizes = [2, 32], strides = [1, 1]} : vector<2x128xf32> to vector<2x32xf32>
    %234 = vector.extract_strided_slice %229 {offsets = [0, 96], sizes = [2, 32], strides = [1, 1]} : vector<2x128xf32> to vector<2x32xf32>
    %235 = arith.mulf %232, %196 : vector<2x32xf32>
    %236 = arith.mulf %231, %233 : vector<2x32xf32>
    %237 = arith.addf %235, %236 : vector<2x32xf32>
    %238 = math.tanh %237 : vector<2x32xf32>
    %239 = arith.mulf %234, %238 : vector<2x32xf32>
    %240 = arith.truncf %239 : vector<2x32xf32> to vector<2x32xbf16>
    %cst_36 = arith.constant dense<0.000000e+00> : vector<2x256xf32>
    %241 = tpu.matmul %240, %8, %cst_36 {dimension_numbers = #tpu.dot_dimension_numbers<[1], [0], [0], [1], [0, 0, 1, 1], [], []>} : vector<2x32xbf16>, vector<32x256xbf16>, vector<2x256xf32> -> vector<2x256xf32>
    %242 = vector.extract_strided_slice %241 {offsets = [0, 0], sizes = [2, 128], strides = [1, 1]} : vector<2x256xf32> to vector<2x128xf32>
    %243 = vector.extract_strided_slice %241 {offsets = [0, 128], sizes = [2, 128], strides = [1, 1]} : vector<2x256xf32> to vector<2x128xf32>
    %244 = arith.truncf %221 : vector<2x32xf32> to vector<2x32xbf16>
    %cst_37 = arith.constant dense<0.000000e+00> : vector<2x128xf32>
    %245 = tpu.matmul %244, %9, %cst_37 {dimension_numbers = #tpu.dot_dimension_numbers<[1], [0], [0], [1], [0, 0, 1, 1], [], []>} : vector<2x32xbf16>, vector<32x128xbf16>, vector<2x128xf32> -> vector<2x128xf32>
    %246 = arith.addf %243, %245 : vector<2x128xf32>
    %247 = arith.addf %246, %12 : vector<2x128xf32>
    %248 = arith.negf %247 : vector<2x128xf32>
    %249 = math.exp %248 : vector<2x128xf32>
    %cst_38 = arith.constant 1.000000e+00 : f32
    %250 = vector.broadcast %cst_38 : f32 to vector<2x128xf32>
    %251 = arith.addf %250, %249 : vector<2x128xf32>
    %252 = arith.divf %250, %251 : vector<2x128xf32>
    %253 = math.tanh %247 : vector<2x128xf32>
    %254 = vector.extract_strided_slice %252 {offsets = [0, 0], sizes = [2, 32], strides = [1, 1]} : vector<2x128xf32> to vector<2x32xf32>
    %255 = vector.extract_strided_slice %252 {offsets = [0, 32], sizes = [2, 32], strides = [1, 1]} : vector<2x128xf32> to vector<2x32xf32>
    %256 = vector.extract_strided_slice %253 {offsets = [0, 64], sizes = [2, 32], strides = [1, 1]} : vector<2x128xf32> to vector<2x32xf32>
    %257 = vector.extract_strided_slice %252 {offsets = [0, 96], sizes = [2, 32], strides = [1, 1]} : vector<2x128xf32> to vector<2x32xf32>
    %258 = arith.mulf %255, %219 : vector<2x32xf32>
    %259 = arith.mulf %254, %256 : vector<2x32xf32>
    %260 = arith.addf %258, %259 : vector<2x32xf32>
    %261 = math.tanh %260 : vector<2x32xf32>
    %262 = arith.mulf %257, %261 : vector<2x32xf32>
    %263 = vector.extract_strided_slice %7 {offsets = [0, 6, 0], sizes = [2, 1, 128], strides = [1, 1, 1]} : vector<2x8x128xf32> to vector<2x1x128xf32>
    %264 = vector.shape_cast %263 : vector<2x1x128xf32> to vector<2x128xf32>
    %265 = arith.addf %264, %242 : vector<2x128xf32>
    %266 = arith.negf %265 : vector<2x128xf32>
    %267 = math.exp %266 : vector<2x128xf32>
    %cst_39 = arith.constant 1.000000e+00 : f32
    %268 = vector.broadcast %cst_39 : f32 to vector<2x128xf32>
    %269 = arith.addf %268, %267 : vector<2x128xf32>
    %270 = arith.divf %268, %269 : vector<2x128xf32>
    %271 = math.tanh %265 : vector<2x128xf32>
    %272 = vector.extract_strided_slice %270 {offsets = [0, 0], sizes = [2, 32], strides = [1, 1]} : vector<2x128xf32> to vector<2x32xf32>
    %273 = vector.extract_strided_slice %270 {offsets = [0, 32], sizes = [2, 32], strides = [1, 1]} : vector<2x128xf32> to vector<2x32xf32>
    %274 = vector.extract_strided_slice %271 {offsets = [0, 64], sizes = [2, 32], strides = [1, 1]} : vector<2x128xf32> to vector<2x32xf32>
    %275 = vector.extract_strided_slice %270 {offsets = [0, 96], sizes = [2, 32], strides = [1, 1]} : vector<2x128xf32> to vector<2x32xf32>
    %276 = arith.mulf %273, %237 : vector<2x32xf32>
    %277 = arith.mulf %272, %274 : vector<2x32xf32>
    %278 = arith.addf %276, %277 : vector<2x32xf32>
    %279 = math.tanh %278 : vector<2x32xf32>
    %280 = arith.mulf %275, %279 : vector<2x32xf32>
    %281 = arith.truncf %280 : vector<2x32xf32> to vector<2x32xbf16>
    %cst_40 = arith.constant dense<0.000000e+00> : vector<2x256xf32>
    %282 = tpu.matmul %281, %8, %cst_40 {dimension_numbers = #tpu.dot_dimension_numbers<[1], [0], [0], [1], [0, 0, 1, 1], [], []>} : vector<2x32xbf16>, vector<32x256xbf16>, vector<2x256xf32> -> vector<2x256xf32>
    %283 = vector.extract_strided_slice %282 {offsets = [0, 0], sizes = [2, 128], strides = [1, 1]} : vector<2x256xf32> to vector<2x128xf32>
    %284 = vector.extract_strided_slice %282 {offsets = [0, 128], sizes = [2, 128], strides = [1, 1]} : vector<2x256xf32> to vector<2x128xf32>
    %285 = arith.truncf %262 : vector<2x32xf32> to vector<2x32xbf16>
    %cst_41 = arith.constant dense<0.000000e+00> : vector<2x128xf32>
    %286 = tpu.matmul %285, %9, %cst_41 {dimension_numbers = #tpu.dot_dimension_numbers<[1], [0], [0], [1], [0, 0, 1, 1], [], []>} : vector<2x32xbf16>, vector<32x128xbf16>, vector<2x128xf32> -> vector<2x128xf32>
    %287 = arith.addf %284, %286 : vector<2x128xf32>
    %288 = arith.addf %287, %12 : vector<2x128xf32>
    %289 = arith.negf %288 : vector<2x128xf32>
    %290 = math.exp %289 : vector<2x128xf32>
    %cst_42 = arith.constant 1.000000e+00 : f32
    %291 = vector.broadcast %cst_42 : f32 to vector<2x128xf32>
    %292 = arith.addf %291, %290 : vector<2x128xf32>
    %293 = arith.divf %291, %292 : vector<2x128xf32>
    %294 = math.tanh %288 : vector<2x128xf32>
    %295 = vector.extract_strided_slice %293 {offsets = [0, 0], sizes = [2, 32], strides = [1, 1]} : vector<2x128xf32> to vector<2x32xf32>
    %296 = vector.extract_strided_slice %293 {offsets = [0, 32], sizes = [2, 32], strides = [1, 1]} : vector<2x128xf32> to vector<2x32xf32>
    %297 = vector.extract_strided_slice %294 {offsets = [0, 64], sizes = [2, 32], strides = [1, 1]} : vector<2x128xf32> to vector<2x32xf32>
    %298 = vector.extract_strided_slice %293 {offsets = [0, 96], sizes = [2, 32], strides = [1, 1]} : vector<2x128xf32> to vector<2x32xf32>
    %299 = arith.mulf %296, %260 : vector<2x32xf32>
    %300 = arith.mulf %295, %297 : vector<2x32xf32>
    %301 = arith.addf %299, %300 : vector<2x32xf32>
    %302 = math.tanh %301 : vector<2x32xf32>
    %303 = arith.mulf %298, %302 : vector<2x32xf32>
    %304 = vector.extract_strided_slice %7 {offsets = [0, 7, 0], sizes = [2, 1, 128], strides = [1, 1, 1]} : vector<2x8x128xf32> to vector<2x1x128xf32>
    %305 = vector.shape_cast %304 : vector<2x1x128xf32> to vector<2x128xf32>
    %306 = arith.addf %305, %283 : vector<2x128xf32>
    %307 = arith.negf %306 : vector<2x128xf32>
    %308 = math.exp %307 : vector<2x128xf32>
    %cst_43 = arith.constant 1.000000e+00 : f32
    %309 = vector.broadcast %cst_43 : f32 to vector<2x128xf32>
    %310 = arith.addf %309, %308 : vector<2x128xf32>
    %311 = arith.divf %309, %310 : vector<2x128xf32>
    %312 = math.tanh %306 : vector<2x128xf32>
    %313 = vector.extract_strided_slice %311 {offsets = [0, 0], sizes = [2, 32], strides = [1, 1]} : vector<2x128xf32> to vector<2x32xf32>
    %314 = vector.extract_strided_slice %311 {offsets = [0, 32], sizes = [2, 32], strides = [1, 1]} : vector<2x128xf32> to vector<2x32xf32>
    %315 = vector.extract_strided_slice %312 {offsets = [0, 64], sizes = [2, 32], strides = [1, 1]} : vector<2x128xf32> to vector<2x32xf32>
    %316 = vector.extract_strided_slice %311 {offsets = [0, 96], sizes = [2, 32], strides = [1, 1]} : vector<2x128xf32> to vector<2x32xf32>
    %317 = arith.mulf %314, %278 : vector<2x32xf32>
    %318 = arith.mulf %313, %315 : vector<2x32xf32>
    %319 = arith.addf %317, %318 : vector<2x32xf32>
    %320 = math.tanh %319 : vector<2x32xf32>
    %321 = arith.mulf %316, %320 : vector<2x32xf32>
    %322 = arith.truncf %321 : vector<2x32xf32> to vector<2x32xbf16>
    %cst_44 = arith.constant dense<0.000000e+00> : vector<2x256xf32>
    %323 = tpu.matmul %322, %8, %cst_44 {dimension_numbers = #tpu.dot_dimension_numbers<[1], [0], [0], [1], [0, 0, 1, 1], [], []>} : vector<2x32xbf16>, vector<32x256xbf16>, vector<2x256xf32> -> vector<2x256xf32>
    %324 = vector.extract_strided_slice %323 {offsets = [0, 128], sizes = [2, 128], strides = [1, 1]} : vector<2x256xf32> to vector<2x128xf32>
    %325 = arith.truncf %303 : vector<2x32xf32> to vector<2x32xbf16>
    %cst_45 = arith.constant dense<0.000000e+00> : vector<2x128xf32>
    %326 = tpu.matmul %325, %9, %cst_45 {dimension_numbers = #tpu.dot_dimension_numbers<[1], [0], [0], [1], [0, 0, 1, 1], [], []>} : vector<2x32xbf16>, vector<32x128xbf16>, vector<2x128xf32> -> vector<2x128xf32>
    %327 = arith.addf %324, %326 : vector<2x128xf32>
    %328 = arith.addf %327, %12 : vector<2x128xf32>
    %329 = arith.negf %328 : vector<2x128xf32>
    %330 = math.exp %329 : vector<2x128xf32>
    %cst_46 = arith.constant 1.000000e+00 : f32
    %331 = vector.broadcast %cst_46 : f32 to vector<2x128xf32>
    %332 = arith.addf %331, %330 : vector<2x128xf32>
    %333 = arith.divf %331, %332 : vector<2x128xf32>
    %334 = math.tanh %328 : vector<2x128xf32>
    %335 = vector.extract_strided_slice %333 {offsets = [0, 0], sizes = [2, 32], strides = [1, 1]} : vector<2x128xf32> to vector<2x32xf32>
    %336 = vector.extract_strided_slice %333 {offsets = [0, 32], sizes = [2, 32], strides = [1, 1]} : vector<2x128xf32> to vector<2x32xf32>
    %337 = vector.extract_strided_slice %334 {offsets = [0, 64], sizes = [2, 32], strides = [1, 1]} : vector<2x128xf32> to vector<2x32xf32>
    %338 = vector.extract_strided_slice %333 {offsets = [0, 96], sizes = [2, 32], strides = [1, 1]} : vector<2x128xf32> to vector<2x32xf32>
    %339 = arith.mulf %336, %301 : vector<2x32xf32>
    %340 = arith.mulf %335, %337 : vector<2x32xf32>
    %341 = arith.addf %339, %340 : vector<2x32xf32>
    %342 = math.tanh %341 : vector<2x32xf32>
    %343 = arith.mulf %338, %342 : vector<2x32xf32>
    %344 = arith.truncf %343 : vector<2x32xf32> to vector<2x32xbf16>
    %c0_47 = arith.constant 0 : index
    %c0_48 = arith.constant 0 : index
    %345 = vector.load %arg7[%c0_47, %c0_48] : memref<32x4xbf16, #tpu.memory_space<vmem>>, vector<32x4xbf16>
    %cst_49 = arith.constant dense<0.000000e+00> : vector<2x4xf32>
    %346 = tpu.matmul %344, %345, %cst_49 {dimension_numbers = #tpu.dot_dimension_numbers<[1], [0], [0], [1], [0, 0, 1, 1], [], []>} : vector<2x32xbf16>, vector<32x4xbf16>, vector<2x4xf32> -> vector<2x4xf32>
    %c0_50 = arith.constant 0 : index
    %c0_51 = arith.constant 0 : index
    %347 = vector.load %arg8[%c0_50, %c0_51] : memref<1x4xf32, #tpu.memory_space<vmem>>, vector<1x4xf32>
    %348 = vector.broadcast %347 : vector<1x4xf32> to vector<2x4xf32>
    %349 = arith.addf %346, %348 : vector<2x4xf32>
    %350 = arith.negf %349 : vector<2x4xf32>
    %351 = math.exp %350 : vector<2x4xf32>
    %cst_52 = arith.constant 1.000000e+00 : f32
    %352 = vector.broadcast %cst_52 : f32 to vector<2x4xf32>
    %353 = arith.addf %352, %351 : vector<2x4xf32>
    %354 = arith.divf %352, %353 : vector<2x4xf32>
    %c0_53 = arith.constant 0 : index
    %c0_54 = arith.constant 0 : index
    %355 = vector.load %arg9[%c0_53, %c0_54] : memref<2x4xf32, #tpu.memory_space<vmem>>, vector<2x4xf32>
    tpu.vector_store %arg9[%c0_53, %c0_54], %354 {strides = array<i32>} : memref<2x4xf32, #tpu.memory_space<vmem>>, vector<2x4xf32>,
    return
  }
  func.func @transform_0(%arg0: i32) -> (i32, i32) {
    %c0_i32 = arith.constant 0 : i32
    %c0_i32_0 = arith.constant 0 : i32
    %c0_i32_1 = arith.constant 0 : i32
    return %c0_i32, %c0_i32_0 : i32, i32
  }
  func.func @transform_1(%arg0: i32) -> (i32, i32) {
    %c0_i32 = arith.constant 0 : i32
    %c0_i32_0 = arith.constant 0 : i32
    %c0_i32_1 = arith.constant 0 : i32
    return %c0_i32, %c0_i32_0 : i32, i32
  }
  func.func @transform_2(%arg0: i32) -> (i32, i32) {
    %c0_i32 = arith.constant 0 : i32
    %c0_i32_0 = arith.constant 0 : i32
    %c0_i32_1 = arith.constant 0 : i32
    return %c0_i32, %c0_i32_0 : i32, i32
  }
  func.func @transform_3(%arg0: i32) -> (i32, i32) {
    %c0_i32 = arith.constant 0 : i32
    %c0_i32_0 = arith.constant 0 : i32
    %c0_i32_1 = arith.constant 0 : i32
    return %c0_i32, %c0_i32_0 : i32, i32
  }
  func.func @transform_4(%arg0: i32) -> (i32, i32) {
    %c0_i32 = arith.constant 0 : i32
    %c0_i32_0 = arith.constant 0 : i32
    %c0_i32_1 = arith.constant 0 : i32
    return %c0_i32, %c0_i32_0 : i32, i32
  }
  func.func @transform_5(%arg0: i32) -> (i32, i32) {
    %c0_i32 = arith.constant 0 : i32
    %c0_i32_0 = arith.constant 0 : i32
    %c0_i32_1 = arith.constant 0 : i32
    return %c0_i32, %c0_i32_0 : i32, i32
  }
  func.func @transform_6(%arg0: i32) -> (i32, i32) {
    %c0_i32 = arith.constant 0 : i32
    %c0_i32_0 = arith.constant 0 : i32
    %c0_i32_1 = arith.constant 0 : i32
    return %c0_i32, %c0_i32_0 : i32, i32
  }
  func.func @transform_7(%arg0: i32) -> (i32, i32) {
    %c0_i32 = arith.constant 0 : i32
    %c0_i32_0 = arith.constant 0 : i32
    %c0_i32_1 = arith.constant 0 : i32
    return %c0_i32, %c0_i32_0 : i32, i32
  }
  func.func @transform_8(%arg0: i32) -> (i32, i32) {
    %c0_i32 = arith.constant 0 : i32
    %c0_i32_0 = arith.constant 0 : i32
    %c0_i32_1 = arith.constant 0 : i32
    return %c0_i32, %c0_i32_0 : i32, i32
  }
}

</mosaic_0001>

<bundles_post_ra>
// kernel: _lambda_.1
= control target key start
LH: loop header
LB: loop body
LE: loop exit
PB: predicated region body
PF: predicated region fallthrough
CT: control target
= control target key end

     0   :  { %13 = vsyncpa [#allocation3], 0  ;;  %s2680_s0 = inlined_call_operand.vmem [shape: f32[16,8], index: 0, kind: input, shape index: {}]   ;;  %s2681_s1 = inlined_call_operand.vmem [shape: bf16[8,128], index: 1, kind: input, shape index: {}]   ;;  %s2682_s2 = inlined_call_operand.hbm [shape: bf16[32,256], index: 2, kind: input, shape index: {}]   ;;  %s2683_s3 = inlined_call_operand.hbm [shape: bf16[32,128], index: 3, kind: input, shape index: {}]   ;;  %s2684_s4 = inlined_call_operand.vmem [shape: f32[1,128], index: 4, kind: input, shape index: {}]   ;;  %s2685_s5 = inlined_call_operand.hbm [shape: f32[1,128], index: 5, kind: input, shape index: {}]   ;;  %s2686_s6 = inlined_call_operand.vmem [shape: bf16[32,4], index: 6, kind: input, shape index: {}]   ;;  %s2687_s7 = inlined_call_operand.vmem [shape: f32[1,4], index: 7, kind: input, shape index: {}]   ;;  %s2688_s8 = inlined_call_operand.hbm [shape: f32[2,4], index: 8, kind: output, shape index: {}]  }
   0x1   :  { %14 = vsyncpa [#allocation6], 0 }
   0x2   :  { %15 = vsyncpa [#allocation4], 0  ;;  %s2245_s27 = smov [#allocation5]  }
   0x3   :  { %s37_s28 = sshll.u32 %s2245_s27, 4  ;;  %s38_s28 = int_to_ptr.vmem [resolvable:$true] %s37_s28 }
   0x4   :  { %s2167_s29 = scalar_lea.vmem %s38_s28, 256  ;;  %p2172_p1 = scmp.lt.s32.totalorder %s38_s28, %s38_s28 }
   0x5   :  { %p2168_p0 = scmp.ne.s32.totalorder %s38_s28, %s2167_s29  ;;  %p2173_p2 = scmp.lt.s32.totalorder %s2167_s29, %s2167_s29 }
   0x7   :  { %p2174_p3 = por %p2173_p2, %p2172_p1 }
   0x9   :  { %p2175_p4 = pnand %p2174_p3, %p2168_p0 }
   0xb   :  { %2178 = shalt.err (!%p2175_p4)
}
   0xc   :  { %s2246_s30 = smov 64   ;;  %s2247_s9 = smov 4  }
   0xd   :  { %43 = dma.hbm_to_vmem [thread:$0]  %s2683_s3, 256, %s38_s28, [#allocation6], %s2246_s30, %s2246_s30, %s2247_s9  }
   0xe   :  { %s2248_s12 = smov [#allocation2]  }
   0xf   :  { %s25_s13 = sshll.u32 %s2248_s12, 4  ;;  %s26_s13 = int_to_ptr.vmem [resolvable:$true] %s25_s13 }
  0x10   :  { %s2187_s14 = scalar_lea.vmem %s26_s13, 512  ;;  %p2192_p6 = scmp.lt.s32.totalorder %s26_s13, %s26_s13 }
  0x11   :  { %p2188_p5 = scmp.ne.s32.totalorder %s26_s13, %s2187_s14  ;;  %p2193_p7 = scmp.lt.s32.totalorder %s2187_s14, %s2187_s14 }
  0x13   :  { %p2194_p8 = por %p2193_p7, %p2192_p6 }
  0x15   :  { %p2195_p9 = pnand %p2194_p8, %p2188_p5 }
  0x17   :  { %2198 = shalt.err (!%p2195_p9)
}
  0x18   :  { %s2249_s15 = smov 128   ;;  %s2250_s16 = smov 8  }
  0x19   :  { %31 = dma.hbm_to_vmem [thread:$0]  %s2682_s2, 512, %s26_s13, [#allocation3], %s2249_s15, %s2249_s15, %s2250_s16  }
  0x1a   :  { %s2251_s19 = smov [#allocation7]  }
  0x1b   :  { %s52_s20 = sshll.u32 %s2251_s19, 4  ;;  %s53_s20 = int_to_ptr.vmem [resolvable:$true] %s52_s20 }
  0x1c   :  { %s2207_s3 = scalar_lea.vmem %s53_s20, 16  ;;  %s2211_s21 = scalar_lea.vmem %s53_s20, 32 }
  0x1d   :  { %p2208_p10 = scmp.ne.s32.totalorder %s53_s20, %s2207_s3  ;;  %p2212_p11 = scmp.lt.s32.totalorder %s53_s20, %s53_s20 }
  0x1e   :  { %p2213_p12 = scmp.lt.s32.totalorder %s2211_s21, %s2207_s3 }
  0x20   :  { %p2214_p13 = por %p2213_p12, %p2212_p11 }
  0x22   :  { %p2215_p0 = pnand %p2214_p13, %p2208_p10 }
  0x24   :  { %2218 = shalt.err (!%p2215_p0)
}
  0x25   :  { %55 = dma.hbm_to_vmem [thread:$0]  %s2685_s5, 16, %s53_s20, [#allocation6]  }
  0x26   :  { %2239 = dma.done.wait [#allocation3], 512  }
  0x27   :  { %2240 = vsyncadd [#allocation3], 4294966784 }
  0x28   :  { %2241 = dma.done.wait [#allocation6], 272  }
  0x29   :  { %2242 = vsyncadd [#allocation6], 4294967024  ;;  %v2252_v0 = vmov 0.0   ;;  %vm2253_vm0 = vmmov 0   ;;  %vm85_vm1 = vcmask 1043456   ;;  %v70_v2 = vld [vmem:[%s2680_s0] sm:$0xff] }
  0x2a   :  { %1856 = vmatprep.subr.bf16.mxu0 %v2252_v0  ;;  %1858 = vmatprep.mubr.msk.bf16.mxu0 %vm2253_vm0, %v2252_v0  ;;  %v73_v1 = vld [vmem:[%s2681_s1] sm:$0xf]  ;;  %v71_v3 = vld [vmem:[%s2680_s0 + $0x8] sm:$0xff]  ;;  %vm81_vm2 = vcmask 64512   ;;  %s2254_s0 = smov 32   ;;  %v2255_v38 = vmov 0  }
  0x2b   :  { %v87_v4 = vsel %vm85_vm1, %v73_v1, 0  ;;  %v72_v5 = vpack.c.bf16 %v71_v3, %v70_v2  ;;  %v1774_v8 = vld [vmem:[%s2684_s4] ss:$0 sm:$0xff]  ;;  %v2350_v34 = vld [vmem:[#allocation2 + $0x14] ss:$8 sps:$4 sm:$0xff]   ;;  %v2354_v36 = vld [vmem:[#allocation5 + $0x8] sm:$0xff]   ;;  %263 = vmatprep.mubr.bf16.mxu1 %v2255_v38 }
  0x2c   :  { %1857 = vmatpush3.bf16.msra.mxu0 %v87_v4  ;;  %v2352_v35 = vld [vmem:[#allocation2 + $0x10] ss:$8 sps:$4 sm:$0xff]   ;;  %v2356_v37 = vld [vmem:[#allocation2 + $0x4] ss:$8 sps:$4 sm:$0xff]   ;;  %243 = vmatprep.subr.bf16.mxu1 %v2350_v34  ;;  %v2364_v41 = vld [vmem:[#allocation2] ss:$8 sps:$4 sm:$0xff]  }
  0x2d   :  { %1862 = vmatprep.subr.bf16.mxu0 %v2252_v0  ;;  %v2361_v39 = vld [vmem:[#allocation5] sm:$0xff]   ;;  %244 = vmatpush1.bf16.msra.mxu1 %v2352_v35  ;;  %vm202_vm3 = vcmask 1041409   ;;  %vm227_vm4 = vcmask 261120   ;;  %v2390_v63 = vld [vmem:[#allocation7] ss:$0 sm:$0xff]  ;;  %vm1756_vm5 = vcmask 25600  }
  0x2e   :  { %245 = vmatprep.subr.bf16.mxu1 %v2356_v37 }
  0x2f   :  { %1859 = vmatmul.mubr.msk.bf16.vlgmr.msra.gmra.mxu0 %vm81_vm2, %v72_v5 }
  0x30   :  { %1866 = vmatprep.mubr.msk.bf16.mxu0 %vm2253_vm0, %v2252_v0  ;;  %1863 = vmatpush3.bf16.msra.mxu0 %v2354_v36 }
  0x31   :  { %1864 = vmatprep.subr.bf16.mxu0 %v2252_v0  ;;  %246 = vmatpush1.bf16.msra.mxu1 %v2364_v41 }
  0x32   :  { %439 = vmatprep.subr.bf16.mxu1 %v2350_v34 }
  0x34   :  { %1865 = vmatpush3.bf16.msra.mxu0 %v2361_v39 }
  0x35   :  { %1870 = vmatprep.subr.bf16.mxu0 %v2252_v0 }
  0x37   :  { %1867 = vmatmul.mubr.bf16.vlgmr.msra.gmra.mxu0 %v2255_v38 }
  0x38   :  { %1871 = vmatpush3.bf16.msra.mxu0 %v2354_v36  ;;  %1874 = vmatprep.mubr.msk.bf16.mxu0 %vm2253_vm0, %v2252_v0 }
  0x39   :  { %1872 = vmatprep.subr.bf16.mxu0 %v2252_v0 }
  0x3c   :  { %1873 = vmatpush3.bf16.msra.mxu0 %v2361_v39 }
  0x3d   :  { %1878 = vmatprep.subr.bf16.mxu0 %v2252_v0 }
  0xef   :  { %v123_v6 = vpop.f32.mrf.mxu0 }
  0xf0   :  { %v2333_v12 = vadd.f32 %v1774_v8, %v123_v6 }
  0xf1   :  { %v1860_v7 = vpop.f32.mrf.mxu0 }
  0xf2   :  { %v1777_v16 = vmul.f32 -1.442695, %v2333_v12 }
  0xf3   :  { %v126_v9 = vpop.f32.mrf.mxu0 }
  0xf4   :  { %v2331_v10 = vadd.f32 %v1774_v8, %v126_v9 }
  0xf5   :  { %v1861_v11 = vpop.f32.mrf.mxu0 }
  0xf6   :  { %1956 = vtanh.f32 %v2331_v10  ;;  %v1778_v15 = vmul.f32 -1.442695, %v2331_v10 }
  0xf7   :  { %1958 = vtanh.f32 %v2333_v12  ;;  %v321_v54 = vpop.f32.mrf.mxu0 }
  0xf8   :  { %1960 = vpow2.f32 %v1778_v15 }
  0xf9   :  { %1962 = vpow2.f32 %v1777_v16  ;;  %v1868_v55 = vpop.f32.mrf.mxu0 }
  0xfb   :  { %v324_v56 = vpop.f32.mrf.mxu0 }
  0xfd   :  { %v1869_v57 = vpop.f32.mrf.mxu0 }
 0x103   :  { %v1957_v13 = vpop.eup %1956 }
 0x104   :  { %167 = vrot.lane.b32.xlu0 %v1957_v13, %s2246_s30  ;;  %v1959_v14 = vpop.eup %1958 }
 0x105   :  { %v1961_v17 = vpop.eup %1960 }
 0x106   :  { %v154_v18 = vadd.f32 1.0, %v1961_v17  ;;  %v1963_v19 = vpop.eup %1962 }
 0x107   :  { %v153_v20 = vadd.f32 1.0, %v1963_v19 }
 0x108   :  { %165 = vrot.lane.b32.xlu0 %v1959_v14, %s2246_s30  ;;  %1964 = vrcp.f32 %v154_v18 }
 0x109   :  { %1966 = vrcp.f32 %v153_v20 }
 0x115   :  { %v1965_v21 = vpop.eup %1964 }
 0x116   :  { %v1967_v24 = vpop.eup %1966  ;;  %v162_v27 = vmul.f32 0.0, %v1965_v21 }
 0x117   :  { %v161_v30 = vmul.f32 0.0, %v1967_v24 }
 0x176   :  { %v168_v22 = vpop.permute.xlu0 %167 }
 0x177   :  { %v172_v23 = vmul.f32 %v1965_v21, %v168_v22 }
 0x179   :  { %177 = vrot.lane.b32.xlu1 %v172_v23, %s2254_s0 }
 0x17a   :  { %v166_v25 = vpop.permute.xlu0 %165 }
 0x17b   :  { %v171_v26 = vmul.f32 %v1967_v24, %v166_v25 }
 0x17d   :  { %175 = vrot.lane.b32.xlu1 %v171_v26, %s2254_s0 }
 0x1eb   :  { %v178_v28 = vpop.permute.xlu1 %177 }
 0x1ec   :  { %v2343_v29 = vadd.f32 %v178_v28, %v162_v27 }
 0x1ee   :  { %1968 = vtanh.f32 %v2343_v29  ;;  %v376_v28 = vrot.slane %v2343_v29, 7 }
 0x1ef   :  { %v176_v31 = vpop.permute.xlu1 %175 }
 0x1f0   :  { %v2346_v32 = vadd.f32 %v176_v31, %v161_v30 }
 0x1f2   :  { %1970 = vtanh.f32 %v2346_v32  ;;  %v375_v31 = vrot.slane %v2346_v32, 7 }
 0x1fb   :  { %v1969_v33 = vpop.eup %1968 }
 0x1fc   :  { %189 = vrot.lane.b32.xlu0 %v1969_v33, %s2246_s30 }
 0x1ff   :  { %v1971_v40 = vpop.eup %1970 }
 0x200   :  { %187 = vrot.lane.b32.xlu1 %v1971_v40, %s2246_s30 }
 0x26e   :  { %v190_v42 = vpop.permute.xlu0 %189 }
 0x26f   :  { %v194_v43 = vmul.f32 %v1965_v21, %v190_v42 }
 0x271   :  { %v196_v44 = vpack.c.bf16 %v194_v43, %v194_v43 }
 0x272   :  { %v188_v45 = vpop.permute.xlu1 %187 }
 0x273   :  { %v200_v46 = vunpack.c.l.b16 %v196_v44  ;;  %v193_v47 = vmul.f32 %v1967_v24, %v188_v45 }
 0x275   :  { %v195_v48 = vpack.c.bf16 %v193_v47, %v193_v47  ;;  %v201_v49 = vrot.slane %v200_v46, 7 }
 0x277   :  { %v199_v50 = vunpack.c.l.b16 %v195_v48 }
 0x279   :  { %v203_v51 = vsel %vm202_vm3, %v201_v49, %v199_v50 }
 0x27a   :  { %v204_v52 = vpack.c.b16 %v203_v51, %v203_v51 }
 0x27c   :  { %205 = vrot.lane.b32.xlu0 %v204_v52, %s2254_s0 }
 0x2ee   :  { %v206_v53 = vpop.permute.xlu0 %205 }
 0x2ef   :  { %1783 = vmatmul.mubr.msk.bf16.vlgmr.msra.gmra.mxu1 %vm227_vm4, %v206_v53 }
 0x2f0   :  { %440 = vmatpush1.bf16.msra.mxu1 %v2352_v35  ;;  %459 = vmatprep.mubr.bf16.mxu1 %v2255_v38 }
 0x2f1   :  { %441 = vmatprep.subr.bf16.mxu1 %v2356_v37 }
 0x2f4   :  { %442 = vmatpush1.bf16.msra.mxu1 %v2364_v41 }
 0x2f5   :  { %629 = vmatprep.subr.bf16.mxu1 %v2350_v34 }
 0x3af   :  { %v265_v58 = vpop.f32.mrf.mxu1 }
 0x3b0   :  { %v354_v59 = vrot.slane %v265_v58, 7  ;;  %v358_v60 = vadd.f32 %v265_v58, %v2331_v10 }
 0x3b1   :  { %v267_v61 = vpop.f32.mrf.mxu1 }
 0x3b2   :  { %v357_v62 = vadd.f32 %v354_v59, %v2333_v12  ;;  %1972 = vtanh.f32 %v358_v60  ;;  %v327_v1 = vadd.f32 %v321_v54, %v267_v61  ;;  %v1788_v8 = vmul.f32 -1.442695, %v358_v60 }
 0x3b3   :  { %v269_v2 = vpop.f32.mrf.mxu1 }
 0x3b4   :  { %1974 = vtanh.f32 %v357_v62  ;;  %v328_v3 = vadd.f32 %v2390_v63, %v327_v1  ;;  %v1787_v9 = vmul.f32 -1.442695, %v357_v62 }
 0x3b5   :  { %v270_v4 = vpop.f32.mrf.mxu1 }
 0x3b6   :  { %1976 = vtanh.f32 %v328_v3  ;;  %v1786_v11 = vmul.f32 -1.442695, %v328_v3 }
 0x3b7   :  { %1978 = vpow2.f32 %v1788_v8 }
 0x3b8   :  { %1980 = vpow2.f32 %v1787_v9 }
 0x3b9   :  { %1982 = vpow2.f32 %v1786_v11 }
 0x3bf   :  { %v1973_v5 = vpop.eup %1972 }
 0x3c0   :  { %385 = vrot.lane.b32.xlu0 %v1973_v5, %s2246_s30 }
 0x3c1   :  { %v1975_v6 = vpop.eup %1974 }
 0x3c2   :  { %383 = vrot.lane.b32.xlu1 %v1975_v6, %s2246_s30 }
 0x3c3   :  { %v1977_v7 = vpop.eup %1976 }
 0x3c4   :  { %v1979_v13 = vpop.eup %1978 }
 0x3c5   :  { %v1981_v14 = vpop.eup %1980  ;;  %v366_v15 = vadd.f32 1.0, %v1979_v13 }
 0x3c6   :  { %338 = vrot.lane.b32.xlu1 %v1977_v7, %s2246_s30  ;;  %v365_v16 = vadd.f32 1.0, %v1981_v14  ;;  %v1983_v17 = vpop.eup %1982 }
 0x3c7   :  { %1984 = vrcp.f32 %v366_v15  ;;  %v332_v18 = vadd.f32 1.0, %v1983_v17 }
 0x3c8   :  { %1986 = vrcp.f32 %v365_v16 }
 0x3c9   :  { %1988 = vrcp.f32 %v332_v18 }
 0x3d4   :  { %v1985_v19 = vpop.eup %1984 }
 0x3d5   :  { %v1987_v22 = vpop.eup %1986  ;;  %v380_v30 = vmul.f32 %v1985_v19, %v376_v28 }
 0x3d6   :  { %v1989_v25 = vpop.eup %1988  ;;  %v379_v42 = vmul.f32 %v1987_v22, %v375_v31 }
 0x3d7   :  { %v336_v45 = vmul.f32 0.0, %v1989_v25 }
 0x432   :  { %v386_v20 = vpop.permute.xlu0 %385 }
 0x433   :  { %v390_v21 = vmul.f32 %v1985_v19, %v386_v20 }
 0x434   :  { %v384_v23 = vpop.permute.xlu1 %383 }
 0x435   :  { %395 = vrot.lane.b32.xlu1 %v390_v21, %s2254_s0  ;;  %v389_v24 = vmul.f32 %v1987_v22, %v384_v23 }
 0x437   :  { %393 = vrot.lane.b32.xlu0 %v389_v24, %s2254_s0 }
 0x438   :  { %v339_v26 = vpop.permute.xlu1 %338 }
 0x439   :  { %v341_v27 = vmul.f32 %v1989_v25, %v339_v26 }
 0x43b   :  { %343 = vrot.lane.b32.xlu0 %v341_v27, %s2254_s0 }
 0x4a7   :  { %v396_v33 = vpop.permute.xlu1 %395 }
 0x4a8   :  { %v2401_v40 = vadd.f32 %v396_v33, %v380_v30 }
 0x4a9   :  { %v394_v43 = vpop.permute.xlu0 %393 }
 0x4aa   :  { %1990 = vtanh.f32 %v2401_v40  ;;  %v2404_v44 = vadd.f32 %v394_v43, %v379_v42 }
 0x4ac   :  { %1992 = vtanh.f32 %v2404_v44 }
 0x4ad   :  { %v344_v46 = vpop.permute.xlu0 %343 }
 0x4ae   :  { %v2407_v47 = vadd.f32 %v344_v46, %v336_v45 }
 0x4b0   :  { %1994 = vtanh.f32 %v2407_v47 }
 0x4b7   :  { %v1991_v29 = vpop.eup %1990 }
 0x4b8   :  { %407 = vrot.lane.b32.xlu0 %v1991_v29, %s2246_s30 }
 0x4b9   :  { %v1993_v32 = vpop.eup %1992 }
 0x4ba   :  { %405 = vrot.lane.b32.xlu1 %v1993_v32, %s2246_s30 }
 0x4bd   :  { %v1995_v48 = vpop.eup %1994 }
 0x4be   :  { %349 = vrot.lane.b32.xlu1 %v1995_v48, %s2246_s30 }
 0x52a   :  { %v408_v49 = vpop.permute.xlu0 %407 }
 0x52b   :  { %v412_v50 = vmul.f32 %v1985_v19, %v408_v49 }
 0x52c   :  { %v406_v51 = vpop.permute.xlu1 %405 }
 0x52d   :  { %v411_v52 = vmul.f32 %v1987_v22, %v406_v51  ;;  %v414_v53 = vpack.c.bf16 %v412_v50, %v412_v50  ;;  %v564_v50 = vrot.slane %v2404_v44, 7  ;;  %v565_v51 = vrot.slane %v2401_v40, 7 }
 0x52f   :  { %v413_v54 = vpack.c.bf16 %v411_v52, %v411_v52  ;;  %v418_v58 = vunpack.c.l.b16 %v414_v53 }
 0x530   :  { %v350_v55 = vpop.permute.xlu1 %349 }
 0x531   :  { %v417_v56 = vunpack.c.l.b16 %v413_v54  ;;  %v352_v57 = vmul.f32 %v1989_v25, %v350_v55 }
 0x533   :  { %v419_v59 = vrot.slane %v417_v56, 1  ;;  %v468_v60 = vpack.c.bf16 %v352_v57, %v352_v57 }
 0x535   :  { %470 = vrot.lane.b32.xlu1 %v468_v60, %s2254_s0  ;;  %v420_v61 = vsel %vm202_vm3, %v418_v58, %v419_v59 }
 0x536   :  { %v421_v62 = vpack.c.b16 %v420_v61, %v420_v61 }
 0x538   :  { %422 = vrot.lane.b32.xlu0 %v421_v62, %s2254_s0 }
 0x5a7   :  { %v471_v1 = vpop.permute.xlu1 %470 }
 0x5a8   :  { %1875 = vmatmul.mubr.msk.bf16.vlgmr.msra.gmra.mxu0 %vm227_vm4, %v471_v1 }
 0x5a9   :  { %1879 = vmatpush3.bf16.msra.mxu0 %v2354_v36  ;;  %1882 = vmatprep.mubr.msk.bf16.mxu0 %vm2253_vm0, %v2252_v0 }
 0x5aa   :  { %v423_v2 = vpop.permute.xlu0 %422  ;;  %1880 = vmatprep.subr.bf16.mxu0 %v2252_v0 }
 0x5ab   :  { %1789 = vmatmul.mubr.msk.bf16.vlgmr.msra.gmra.mxu1 %vm227_vm4, %v423_v2 }
 0x5ac   :  { %630 = vmatpush1.bf16.msra.mxu1 %v2352_v35  ;;  %649 = vmatprep.mubr.bf16.mxu1 %v2255_v38 }
 0x5ad   :  { %1881 = vmatpush3.bf16.msra.mxu0 %v2361_v39  ;;  %631 = vmatprep.subr.bf16.mxu1 %v2356_v37 }
 0x5ae   :  { %1886 = vmatprep.subr.bf16.mxu0 %v2252_v0 }
 0x5b0   :  { %632 = vmatpush1.bf16.msra.mxu1 %v2364_v41 }
 0x5b1   :  { %819 = vmatprep.subr.bf16.mxu1 %v2350_v34 }
 0x668   :  { %v509_v3 = vpop.f32.mrf.mxu0 }
 0x66a   :  { %v1876_v4 = vpop.f32.mrf.mxu0 }
 0x66b   :  { %v461_v5 = vpop.f32.mrf.mxu1 }
 0x66c   :  { %v542_v6 = vrot.slane %v461_v5, 6  ;;  %v543_v7 = vrot.slane %v461_v5, 7  ;;  %v512_v8 = vpop.f32.mrf.mxu0 }
 0x66d   :  { %v463_v9 = vpop.f32.mrf.mxu1 }
 0x66e   :  { %v546_v11 = vadd.f32 %v542_v6, %v2333_v12  ;;  %v547_v13 = vadd.f32 %v543_v7, %v2331_v10  ;;  %v515_v14 = vadd.f32 %v509_v3, %v463_v9  ;;  %v1877_v15 = vpop.f32.mrf.mxu0 }
 0x66f   :  { %v465_v16 = vpop.f32.mrf.mxu1 }
 0x670   :  { %1996 = vtanh.f32 %v546_v11  ;;  %v516_v17 = vadd.f32 %v2390_v63, %v515_v14  ;;  %v1792_v22 = vmul.f32 -1.442695, %v546_v11  ;;  %v1793_v23 = vmul.f32 -1.442695, %v547_v13 }
 0x671   :  { %1998 = vtanh.f32 %v547_v13  ;;  %v466_v18 = vpop.f32.mrf.mxu1 }
 0x672   :  { %2000 = vtanh.f32 %v516_v17  ;;  %v1791_v24 = vmul.f32 -1.442695, %v516_v17 }
 0x673   :  { %2002 = vpow2.f32 %v1792_v22 }
 0x674   :  { %2004 = vpow2.f32 %v1793_v23 }
 0x675   :  { %2006 = vpow2.f32 %v1791_v24 }
 0x67d   :  { %v1997_v19 = vpop.eup %1996 }
 0x67e   :  { %v1999_v20 = vpop.eup %1998  ;;  %572 = vrot.lane.b32.xlu0 %v1997_v19, %s2246_s30 }
 0x67f   :  { %574 = vrot.lane.b32.xlu1 %v1999_v20, %s2246_s30  ;;  %v2001_v21 = vpop.eup %2000 }
 0x680   :  { %v2003_v25 = vpop.eup %2002 }
 0x681   :  { %v2005_v26 = vpop.eup %2004  ;;  %v554_v27 = vadd.f32 1.0, %v2003_v25 }
 0x682   :  { %526 = vrot.lane.b32.xlu0 %v2001_v21, %s2246_s30  ;;  %v555_v28 = vadd.f32 1.0, %v2005_v26  ;;  %v2007_v30 = vpop.eup %2006 }
 0x683   :  { %2008 = vrcp.f32 %v554_v27  ;;  %v520_v31 = vadd.f32 1.0, %v2007_v30 }
 0x684   :  { %2010 = vrcp.f32 %v555_v28 }
 0x685   :  { %2012 = vrcp.f32 %v520_v31 }
 0x690   :  { %v2009_v33 = vpop.eup %2008 }
 0x691   :  { %v2011_v43 = vpop.eup %2010  ;;  %v568_v52 = vmul.f32 %v2009_v33, %v564_v50 }
 0x692   :  { %v2013_v32 = vpop.eup %2012  ;;  %v569_v54 = vmul.f32 %v2011_v43, %v565_v51 }
 0x693   :  { %v524_v58 = vmul.f32 %v2013_v32, %v2407_v47 }
 0x6f0   :  { %v573_v42 = vpop.permute.xlu0 %572 }
 0x6f1   :  { %v578_v45 = vmul.f32 %v2009_v33, %v573_v42  ;;  %v575_v46 = vpop.permute.xlu1 %574 }
 0x6f2   :  { %v579_v29 = vmul.f32 %v2011_v43, %v575_v46 }
 0x6f3   :  { %582 = vrot.lane.b32.xlu1 %v578_v45, %s2254_s0 }
 0x6f4   :  { %584 = vrot.lane.b32.xlu0 %v579_v29, %s2254_s0  ;;  %v527_v48 = vpop.permute.xlu0 %526 }
 0x6f5   :  { %v529_v49 = vmul.f32 %v2013_v32, %v527_v48 }
 0x6f7   :  { %531 = vrot.lane.b32.xlu1 %v529_v49, %s2254_s0 }
 0x765   :  { %v583_v53 = vpop.permute.xlu1 %582 }
 0x766   :  { %v2440_v55 = vadd.f32 %v583_v53, %v568_v52  ;;  %v585_v56 = vpop.permute.xlu0 %584 }
 0x767   :  { %v2442_v57 = vadd.f32 %v585_v56, %v569_v54 }
 0x768   :  { %2014 = vtanh.f32 %v2440_v55 }
 0x769   :  { %2016 = vtanh.f32 %v2442_v57  ;;  %v532_v59 = vpop.permute.xlu1 %531 }
 0x76a   :  { %v2447_v60 = vadd.f32 %v532_v59, %v524_v58 }
 0x76c   :  { %2018 = vtanh.f32 %v2447_v60 }
 0x775   :  { %v2015_v40 = vpop.eup %2014 }
 0x776   :  { %v2017_v44 = vpop.eup %2016  ;;  %594 = vrot.lane.b32.xlu0 %v2015_v40, %s2246_s30 }
 0x777   :  { %596 = vrot.lane.b32.xlu1 %v2017_v44, %s2246_s30 }
 0x779   :  { %v2019_v61 = vpop.eup %2018 }
 0x77a   :  { %537 = vrot.lane.b32.xlu0 %v2019_v61, %s2246_s30 }
 0x7e8   :  { %v595_v62 = vpop.permute.xlu0 %594 }
 0x7e9   :  { %v600_v1 = vmul.f32 %v2009_v33, %v595_v62  ;;  %v597_v2 = vpop.permute.xlu1 %596 }
 0x7ea   :  { %v601_v3 = vmul.f32 %v2011_v43, %v597_v2  ;;  %v754_v2 = vrot.slane %v2440_v55, 7 }
 0x7eb   :  { %v602_v4 = vpack.c.bf16 %v600_v1, %v600_v1 }
 0x7ec   :  { %v603_v47 = vpack.c.bf16 %v601_v3, %v601_v3  ;;  %v538_v6 = vpop.permute.xlu0 %537  ;;  %v755_v3 = vrot.slane %v2442_v57, 7 }
 0x7ed   :  { %v606_v5 = vunpack.c.l.b16 %v602_v4  ;;  %v540_v8 = vmul.f32 %v2013_v32, %v538_v6 }
 0x7ee   :  { %v607_v7 = vunpack.c.l.b16 %v603_v47 }
 0x7ef   :  { %v608_v9 = vrot.slane %v606_v5, 2  ;;  %v658_v13 = vpack.c.bf16 %v540_v8, %v540_v8 }
 0x7f0   :  { %v609_v11 = vrot.slane %v607_v7, 1 }
 0x7f1   :  { %660 = vrot.lane.b32.xlu0 %v658_v13, %s2254_s0 }
 0x7f2   :  { %v610_v14 = vsel %vm202_vm3, %v609_v11, %v608_v9 }
 0x7f3   :  { %v611_v15 = vpack.c.b16 %v610_v14, %v610_v14 }
 0x7f5   :  { %612 = vrot.lane.b32.xlu1 %v611_v15, %s2254_s0 }
 0x863   :  { %v661_v16 = vpop.permute.xlu0 %660 }
 0x864   :  { %1883 = vmatmul.mubr.msk.bf16.vlgmr.msra.gmra.mxu0 %vm227_vm4, %v661_v16 }
 0x865   :  { %1887 = vmatpush3.bf16.msra.mxu0 %v2354_v36  ;;  %1890 = vmatprep.mubr.msk.bf16.mxu0 %vm2253_vm0, %v2252_v0 }
 0x866   :  { %1888 = vmatprep.subr.bf16.mxu0 %v2252_v0 }
 0x867   :  { %v613_v17 = vpop.permute.xlu1 %612 }
 0x868   :  { %1794 = vmatmul.mubr.msk.bf16.vlgmr.msra.gmra.mxu1 %vm227_vm4, %v613_v17 }
 0x869   :  { %820 = vmatpush1.bf16.msra.mxu1 %v2352_v35  ;;  %839 = vmatprep.mubr.bf16.mxu1 %v2255_v38 }
 0x86a   :  { %1889 = vmatpush3.bf16.msra.mxu0 %v2361_v39  ;;  %821 = vmatprep.subr.bf16.mxu1 %v2356_v37 }
 0x86b   :  { %1894 = vmatprep.subr.bf16.mxu0 %v2252_v0 }
 0x86d   :  { %822 = vmatpush1.bf16.msra.mxu1 %v2364_v41 }
 0x86e   :  { %1009 = vmatprep.subr.bf16.mxu1 %v2350_v34 }
 0x924   :  { %v699_v18 = vpop.f32.mrf.mxu0 }
 0x926   :  { %v1884_v19 = vpop.f32.mrf.mxu0 }
 0x928   :  { %v651_v20 = vpop.f32.mrf.mxu1  ;;  %v702_v23 = vpop.f32.mrf.mxu0 }
 0x929   :  { %v732_v21 = vrot.slane %v651_v20, 5  ;;  %v733_v22 = vrot.slane %v651_v20, 6 }
 0x92a   :  { %v653_v24 = vpop.f32.mrf.mxu1  ;;  %v1885_v28 = vpop.f32.mrf.mxu0 }
 0x92b   :  { %v736_v25 = vadd.f32 %v732_v21, %v2333_v12  ;;  %v737_v26 = vadd.f32 %v733_v22, %v2331_v10  ;;  %v705_v27 = vadd.f32 %v699_v18, %v653_v24 }
 0x92c   :  { %v655_v30 = vpop.f32.mrf.mxu1 }
 0x92d   :  { %2020 = vtanh.f32 %v736_v25  ;;  %v706_v31 = vadd.f32 %v2390_v63, %v705_v27  ;;  %v1797_v46 = vmul.f32 -1.442695, %v736_v25  ;;  %v1798_v29 = vmul.f32 -1.442695, %v737_v26 }
 0x92e   :  { %2022 = vtanh.f32 %v737_v26  ;;  %v656_v33 = vpop.f32.mrf.mxu1 }
 0x92f   :  { %2024 = vtanh.f32 %v706_v31  ;;  %v1796_v32 = vmul.f32 -1.442695, %v706_v31 }
 0x930   :  { %2026 = vpow2.f32 %v1797_v46 }
 0x931   :  { %2028 = vpow2.f32 %v1798_v29 }
 0x932   :  { %2030 = vpow2.f32 %v1796_v32 }
 0x93a   :  { %v2021_v42 = vpop.eup %2020 }
 0x93b   :  { %v2023_v43 = vpop.eup %2022  ;;  %762 = vrot.lane.b32.xlu1 %v2021_v42, %s2246_s30 }
 0x93c   :  { %764 = vrot.lane.b32.xlu0 %v2023_v43, %s2246_s30  ;;  %v2025_v45 = vpop.eup %2024 }
 0x93d   :  { %v2027_v48 = vpop.eup %2026 }
 0x93e   :  { %v2029_v49 = vpop.eup %2028  ;;  %v744_v50 = vadd.f32 1.0, %v2027_v48 }
 0x93f   :  { %716 = vrot.lane.b32.xlu1 %v2025_v45, %s2246_s30  ;;  %v745_v51 = vadd.f32 1.0, %v2029_v49  ;;  %v2031_v52 = vpop.eup %2030 }
 0x940   :  { %2032 = vrcp.f32 %v744_v50  ;;  %v710_v53 = vadd.f32 1.0, %v2031_v52 }
 0x941   :  { %2034 = vrcp.f32 %v745_v51 }
 0x942   :  { %2036 = vrcp.f32 %v710_v53 }
 0x94d   :  { %v2033_v54 = vpop.eup %2032 }
 0x94e   :  { %v2035_v58 = vpop.eup %2034  ;;  %v758_v4 = vmul.f32 %v2033_v54, %v754_v2 }
 0x94f   :  { %v2037_v61 = vpop.eup %2036  ;;  %v759_v5 = vmul.f32 %v2035_v58, %v755_v3 }
 0x950   :  { %v714_v9 = vmul.f32 %v2037_v61, %v2447_v60 }
 0x9ad   :  { %v763_v56 = vpop.permute.xlu1 %762 }
 0x9ae   :  { %v768_v59 = vmul.f32 %v2033_v54, %v763_v56  ;;  %v765_v40 = vpop.permute.xlu0 %764 }
 0x9af   :  { %v769_v44 = vmul.f32 %v2035_v58, %v765_v40 }
 0x9b0   :  { %772 = vrot.lane.b32.xlu0 %v768_v59, %s2254_s0 }
 0x9b1   :  { %774 = vrot.lane.b32.xlu1 %v769_v44, %s2254_s0  ;;  %v717_v62 = vpop.permute.xlu1 %716 }
 0x9b2   :  { %v719_v1 = vmul.f32 %v2037_v61, %v717_v62 }
 0x9b4   :  { %721 = vrot.lane.b32.xlu0 %v719_v1, %s2254_s0 }
 0xa22   :  { %v773_v47 = vpop.permute.xlu0 %772 }
 0xa23   :  { %v2480_v6 = vadd.f32 %v773_v47, %v758_v4  ;;  %v775_v7 = vpop.permute.xlu1 %774 }
 0xa24   :  { %v2482_v8 = vadd.f32 %v775_v7, %v759_v5 }
 0xa25   :  { %2038 = vtanh.f32 %v2480_v6 }
 0xa26   :  { %2040 = vtanh.f32 %v2482_v8  ;;  %v722_v11 = vpop.permute.xlu0 %721 }
 0xa27   :  { %v2487_v13 = vadd.f32 %v722_v11, %v714_v9 }
 0xa29   :  { %2042 = vtanh.f32 %v2487_v13 }
 0xa32   :  { %v2039_v55 = vpop.eup %2038 }
 0xa33   :  { %v2041_v57 = vpop.eup %2040  ;;  %784 = vrot.lane.b32.xlu1 %v2039_v55, %s2246_s30 }
 0xa34   :  { %786 = vrot.lane.b32.xlu0 %v2041_v57, %s2246_s30 }
 0xa36   :  { %v2043_v14 = vpop.eup %2042 }
 0xa37   :  { %727 = vrot.lane.b32.xlu1 %v2043_v14, %s2246_s30 }
 0xaa5   :  { %v785_v15 = vpop.permute.xlu1 %784 }
 0xaa6   :  { %v790_v16 = vmul.f32 %v2033_v54, %v785_v15  ;;  %v787_v17 = vpop.permute.xlu0 %786 }
 0xaa7   :  { %v791_v18 = vmul.f32 %v2035_v58, %v787_v17  ;;  %v944_v17 = vrot.slane %v2480_v6, 7 }
 0xaa8   :  { %v792_v19 = vpack.c.bf16 %v790_v16, %v790_v16 }
 0xaa9   :  { %v793_v60 = vpack.c.bf16 %v791_v18, %v791_v18  ;;  %v728_v21 = vpop.permute.xlu1 %727  ;;  %v945_v18 = vrot.slane %v2482_v8, 7 }
 0xaaa   :  { %v796_v20 = vunpack.c.l.b16 %v792_v19  ;;  %v730_v23 = vmul.f32 %v2037_v61, %v728_v21 }
 0xaab   :  { %v797_v22 = vunpack.c.l.b16 %v793_v60 }
 0xaac   :  { %v798_v24 = vrot.slane %v796_v20, 3  ;;  %v848_v26 = vpack.c.bf16 %v730_v23, %v730_v23 }
 0xaad   :  { %v799_v25 = vrot.slane %v797_v22, 2 }
 0xaae   :  { %850 = vrot.lane.b32.xlu1 %v848_v26, %s2254_s0 }
 0xaaf   :  { %v800_v27 = vsel %vm202_vm3, %v799_v25, %v798_v24 }
 0xab0   :  { %v801_v28 = vpack.c.b16 %v800_v27, %v800_v27 }
 0xab2   :  { %802 = vrot.lane.b32.xlu0 %v801_v28, %s2254_s0 }
 0xb20   :  { %v851_v30 = vpop.permute.xlu1 %850 }
 0xb21   :  { %1891 = vmatmul.mubr.msk.bf16.vlgmr.msra.gmra.mxu0 %vm227_vm4, %v851_v30 }
 0xb22   :  { %1895 = vmatpush3.bf16.msra.mxu0 %v2354_v36  ;;  %1898 = vmatprep.mubr.msk.bf16.mxu0 %vm2253_vm0, %v2252_v0 }
 0xb23   :  { %1896 = vmatprep.subr.bf16.mxu0 %v2252_v0 }
 0xb24   :  { %v803_v31 = vpop.permute.xlu0 %802 }
 0xb25   :  { %1799 = vmatmul.mubr.msk.bf16.vlgmr.msra.gmra.mxu1 %vm227_vm4, %v803_v31 }
 0xb26   :  { %1010 = vmatpush1.bf16.msra.mxu1 %v2352_v35  ;;  %1029 = vmatprep.mubr.bf16.mxu1 %v2255_v38 }
 0xb27   :  { %1897 = vmatpush3.bf16.msra.mxu0 %v2361_v39  ;;  %1011 = vmatprep.subr.bf16.mxu1 %v2356_v37 }
 0xb28   :  { %1902 = vmatprep.subr.bf16.mxu0 %v2252_v0 }
 0xb2a   :  { %1012 = vmatpush1.bf16.msra.mxu1 %v2364_v41 }
 0xb2b   :  { %1199 = vmatprep.subr.bf16.mxu1 %v2350_v34 }
 0xbe1   :  { %v889_v33 = vpop.f32.mrf.mxu0 }
 0xbe3   :  { %v1892_v42 = vpop.f32.mrf.mxu0 }
 0xbe5   :  { %v841_v43 = vpop.f32.mrf.mxu1  ;;  %v892_v29 = vpop.f32.mrf.mxu0 }
 0xbe6   :  { %v922_v45 = vrot.slane %v841_v43, 4  ;;  %v923_v46 = vrot.slane %v841_v43, 5 }
 0xbe7   :  { %v843_v32 = vpop.f32.mrf.mxu1  ;;  %v1893_v51 = vpop.f32.mrf.mxu0 }
 0xbe8   :  { %v926_v48 = vadd.f32 %v922_v45, %v2333_v12  ;;  %v927_v49 = vadd.f32 %v923_v46, %v2331_v10  ;;  %v895_v50 = vadd.f32 %v889_v33, %v843_v32 }
 0xbe9   :  { %v845_v52 = vpop.f32.mrf.mxu1 }
 0xbea   :  { %2044 = vtanh.f32 %v926_v48  ;;  %v896_v53 = vadd.f32 %v2390_v63, %v895_v50  ;;  %v1802_v40 = vmul.f32 -1.442695, %v926_v48  ;;  %v1803_v44 = vmul.f32 -1.442695, %v927_v49 }
 0xbeb   :  { %2046 = vtanh.f32 %v927_v49  ;;  %v846_v54 = vpop.f32.mrf.mxu1 }
 0xbec   :  { %2048 = vtanh.f32 %v896_v53  ;;  %v1801_v61 = vmul.f32 -1.442695, %v896_v53 }
 0xbed   :  { %2050 = vpow2.f32 %v1802_v40 }
 0xbee   :  { %2052 = vpow2.f32 %v1803_v44 }
 0xbef   :  { %2054 = vpow2.f32 %v1801_v61 }
 0xbf7   :  { %v2045_v56 = vpop.eup %2044 }
 0xbf8   :  { %v2047_v58 = vpop.eup %2046  ;;  %952 = vrot.lane.b32.xlu0 %v2045_v56, %s2246_s30 }
 0xbf9   :  { %954 = vrot.lane.b32.xlu1 %v2047_v58, %s2246_s30  ;;  %v2049_v59 = vpop.eup %2048 }
 0xbfa   :  { %v2051_v62 = vpop.eup %2050 }
 0xbfb   :  { %v2053_v1 = vpop.eup %2052  ;;  %v934_v2 = vadd.f32 1.0, %v2051_v62 }
 0xbfc   :  { %906 = vrot.lane.b32.xlu0 %v2049_v59, %s2246_s30  ;;  %v935_v3 = vadd.f32 1.0, %v2053_v1  ;;  %v2055_v4 = vpop.eup %2054 }
 0xbfd   :  { %2056 = vrcp.f32 %v934_v2  ;;  %v900_v47 = vadd.f32 1.0, %v2055_v4 }
 0xbfe   :  { %2058 = vrcp.f32 %v935_v3 }
 0xbff   :  { %2060 = vrcp.f32 %v900_v47 }
 0xc0a   :  { %v2057_v5 = vpop.eup %2056 }
 0xc0b   :  { %v2059_v9 = vpop.eup %2058  ;;  %v948_v19 = vmul.f32 %v2057_v5, %v944_v17 }
 0xc0c   :  { %v2061_v14 = vpop.eup %2060  ;;  %v949_v20 = vmul.f32 %v2059_v9, %v945_v18 }
 0xc0d   :  { %v904_v24 = vmul.f32 %v2061_v14, %v2487_v13 }
 0xc6a   :  { %v953_v7 = vpop.permute.xlu0 %952 }
 0xc6b   :  { %v958_v11 = vmul.f32 %v2057_v5, %v953_v7  ;;  %v955_v55 = vpop.permute.xlu1 %954 }
 0xc6c   :  { %v959_v57 = vmul.f32 %v2059_v9, %v955_v55 }
 0xc6d   :  { %962 = vrot.lane.b32.xlu1 %v958_v11, %s2254_s0 }
 0xc6e   :  { %964 = vrot.lane.b32.xlu0 %v959_v57, %s2254_s0  ;;  %v907_v15 = vpop.permute.xlu0 %906 }
 0xc6f   :  { %v909_v16 = vmul.f32 %v2061_v14, %v907_v15 }
 0xc71   :  { %911 = vrot.lane.b32.xlu1 %v909_v16, %s2254_s0 }
 0xcdf   :  { %v963_v60 = vpop.permute.xlu1 %962 }
 0xce0   :  { %v2520_v21 = vadd.f32 %v963_v60, %v948_v19  ;;  %v965_v22 = vpop.permute.xlu0 %964 }
 0xce1   :  { %v2522_v23 = vadd.f32 %v965_v22, %v949_v20 }
 0xce2   :  { %2062 = vtanh.f32 %v2520_v21 }
 0xce3   :  { %2064 = vtanh.f32 %v2522_v23  ;;  %v912_v25 = vpop.permute.xlu1 %911 }
 0xce4   :  { %v2527_v26 = vadd.f32 %v912_v25, %v904_v24  ;;  %v1134_v25 = vrot.slane %v2520_v21, 7 }
 0xce6   :  { %2066 = vtanh.f32 %v2527_v26 }
 0xcef   :  { %v2063_v6 = vpop.eup %2062 }
 0xcf0   :  { %v2065_v8 = vpop.eup %2064  ;;  %974 = vrot.lane.b32.xlu0 %v2063_v6, %s2246_s30  ;;  %v1135_v6 = vrot.slane %v2522_v23, 7 }
 0xcf1   :  { %976 = vrot.lane.b32.xlu1 %v2065_v8, %s2246_s30 }
 0xcf3   :  { %v2067_v27 = vpop.eup %2066 }
 0xcf4   :  { %917 = vrot.lane.b32.xlu0 %v2067_v27, %s2246_s30 }
 0xd62   :  { %v975_v28 = vpop.permute.xlu0 %974 }
 0xd63   :  { %v980_v30 = vmul.f32 %v2057_v5, %v975_v28  ;;  %v977_v31 = vpop.permute.xlu1 %976 }
 0xd64   :  { %v981_v33 = vmul.f32 %v2059_v9, %v977_v31 }
 0xd65   :  { %v982_v42 = vpack.c.bf16 %v980_v30, %v980_v30 }
 0xd66   :  { %v983_v13 = vpack.c.bf16 %v981_v33, %v981_v33  ;;  %v918_v45 = vpop.permute.xlu0 %917 }
 0xd67   :  { %v986_v43 = vunpack.c.l.b16 %v982_v42  ;;  %v920_v29 = vmul.f32 %v2061_v14, %v918_v45 }
 0xd68   :  { %v987_v46 = vunpack.c.l.b16 %v983_v13 }
 0xd69   :  { %v988_v32 = vrot.slane %v986_v43, 4  ;;  %v1038_v49 = vpack.c.bf16 %v920_v29, %v920_v29 }
 0xd6a   :  { %v989_v48 = vrot.slane %v987_v46, 3 }
 0xd6b   :  { %1040 = vrot.lane.b32.xlu0 %v1038_v49, %s2254_s0 }
 0xd6c   :  { %v990_v50 = vsel %vm202_vm3, %v989_v48, %v988_v32 }
 0xd6d   :  { %v991_v51 = vpack.c.b16 %v990_v50, %v990_v50 }
 0xd6f   :  { %992 = vrot.lane.b32.xlu1 %v991_v51, %s2254_s0 }
 0xddd   :  { %v1041_v52 = vpop.permute.xlu0 %1040 }
 0xdde   :  { %1899 = vmatmul.mubr.msk.bf16.vlgmr.msra.gmra.mxu0 %vm227_vm4, %v1041_v52 }
 0xddf   :  { %1903 = vmatpush3.bf16.msra.mxu0 %v2354_v36  ;;  %1906 = vmatprep.mubr.msk.bf16.mxu0 %vm2253_vm0, %v2252_v0 }
 0xde0   :  { %1904 = vmatprep.subr.bf16.mxu0 %v2252_v0 }
 0xde1   :  { %v993_v53 = vpop.permute.xlu1 %992 }
 0xde2   :  { %1804 = vmatmul.mubr.msk.bf16.vlgmr.msra.gmra.mxu1 %vm227_vm4, %v993_v53 }
 0xde3   :  { %1200 = vmatpush1.bf16.msra.mxu1 %v2352_v35  ;;  %1219 = vmatprep.mubr.bf16.mxu1 %v2255_v38 }
 0xde4   :  { %1905 = vmatpush3.bf16.msra.mxu0 %v2361_v39  ;;  %1201 = vmatprep.subr.bf16.mxu1 %v2356_v37 }
 0xde5   :  { %1910 = vmatprep.subr.bf16.mxu0 %v2252_v0 }
 0xde7   :  { %1202 = vmatpush1.bf16.msra.mxu1 %v2364_v41 }
 0xde8   :  { %1389 = vmatprep.subr.bf16.mxu1 %v2350_v34 }
 0xe9e   :  { %v1079_v36 = vpop.f32.mrf.mxu0 }
 0xea0   :  { %v1900_v54 = vpop.f32.mrf.mxu0 }
 0xea2   :  { %v1031_v56 = vpop.f32.mrf.mxu1  ;;  %v1082_v40 = vpop.f32.mrf.mxu0 }
 0xea3   :  { %v1112_v58 = vrot.slane %v1031_v56, 3  ;;  %v1113_v59 = vrot.slane %v1031_v56, 4 }
 0xea4   :  { %v1033_v44 = vpop.f32.mrf.mxu1  ;;  %v1901_v62 = vpop.f32.mrf.mxu0 }
 0xea5   :  { %v1116_v35 = vadd.f32 %v1112_v58, %v2333_v12  ;;  %v1117_v61 = vadd.f32 %v1113_v59, %v2331_v10  ;;  %v1085_v39 = vadd.f32 %v1079_v36, %v1033_v44  ;;  %v2577_v44 = vld [vmem:[#allocation5 + $0x8] sm:$0xff]  }
 0xea6   :  { %v1035_v37 = vpop.f32.mrf.mxu1  ;;  %v2591_v62 = vld [vmem:[#allocation2 + $0x4] ss:$8 sps:$4 sm:$0xff]  }
 0xea7   :  { %2068 = vtanh.f32 %v1116_v35  ;;  %v1086_v41 = vadd.f32 %v2390_v63, %v1085_v39  ;;  %v1807_v4 = vmul.f32 -1.442695, %v1116_v35  ;;  %v1808_v47 = vmul.f32 -1.442695, %v1117_v61  ;;  %v2588_v39 = vld [vmem:[#allocation5] sm:$0xff]  }
 0xea8   :  { %2070 = vtanh.f32 %v1117_v61  ;;  %v1036_v1 = vpop.f32.mrf.mxu1  ;;  %v2584_v61 = vld [vmem:[#allocation2 + $0x10] ss:$8 sps:$4 sm:$0xff]   ;;  %v2595_v37 = vld [vmem:[#allocation2] ss:$8 sps:$4 sm:$0xff]  }
 0xea9   :  { %2072 = vtanh.f32 %v1086_v41  ;;  %v1806_v5 = vmul.f32 -1.442695, %v1086_v41  ;;  %v2157_v41 = vld [vmem:[#allocation2 + $0x14] ss:$8 sps:$4 sm:$0xff]  }
 0xeaa   :  { %2074 = vpow2.f32 %v1807_v4 }
 0xeab   :  { %2076 = vpow2.f32 %v1808_v47 }
 0xeac   :  { %2078 = vpow2.f32 %v1806_v5 }
 0xeb4   :  { %v2069_v34 = vpop.eup %2068 }
 0xeb5   :  { %v2071_v2 = vpop.eup %2070  ;;  %1142 = vrot.lane.b32.xlu1 %v2069_v34, %s2246_s30 }
 0xeb6   :  { %1144 = vrot.lane.b32.xlu0 %v2071_v2, %s2246_s30  ;;  %v2073_v3 = vpop.eup %2072 }
 0xeb7   :  { %v2075_v7 = vpop.eup %2074 }
 0xeb8   :  { %v2077_v9 = vpop.eup %2076  ;;  %v1124_v11 = vadd.f32 1.0, %v2075_v7 }
 0xeb9   :  { %1096 = vrot.lane.b32.xlu1 %v2073_v3, %s2246_s30  ;;  %v1125_v55 = vadd.f32 1.0, %v2077_v9  ;;  %v2079_v57 = vpop.eup %2078 }
 0xeba   :  { %2080 = vrcp.f32 %v1124_v11  ;;  %v1090_v14 = vadd.f32 1.0, %v2079_v57 }
 0xebb   :  { %2082 = vrcp.f32 %v1125_v55 }
 0xebc   :  { %2084 = vrcp.f32 %v1090_v14 }
 0xec7   :  { %v2081_v15 = vpop.eup %2080 }
 0xec8   :  { %v2083_v17 = vpop.eup %2082  ;;  %v1138_v8 = vmul.f32 %v2081_v15, %v1134_v25 }
 0xec9   :  { %v2085_v20 = vpop.eup %2084  ;;  %v1139_v28 = vmul.f32 %v2083_v17, %v1135_v6 }
 0xeca   :  { %v1094_v42 = vmul.f32 %v2085_v20, %v2527_v26 }
 0xf27   :  { %v1143_v16 = vpop.permute.xlu1 %1142 }
 0xf28   :  { %v1148_v18 = vmul.f32 %v2081_v15, %v1143_v16  ;;  %v1145_v19 = vpop.permute.xlu0 %1144 }
 0xf29   :  { %v1149_v60 = vmul.f32 %v2083_v17, %v1145_v19 }
 0xf2a   :  { %1152 = vrot.lane.b32.xlu0 %v1148_v18, %s2254_s0 }
 0xf2b   :  { %1154 = vrot.lane.b32.xlu1 %v1149_v60, %s2254_s0  ;;  %v1097_v22 = vpop.permute.xlu1 %1096 }
 0xf2c   :  { %v1099_v24 = vmul.f32 %v2085_v20, %v1097_v22 }
 0xf2e   :  { %1101 = vrot.lane.b32.xlu0 %v1099_v24, %s2254_s0 }
 0xf9c   :  { %v1153_v27 = vpop.permute.xlu0 %1152 }
 0xf9d   :  { %v2560_v30 = vadd.f32 %v1153_v27, %v1138_v8  ;;  %v1155_v31 = vpop.permute.xlu1 %1154 }
 0xf9e   :  { %v2562_v33 = vadd.f32 %v1155_v31, %v1139_v28 }
 0xf9f   :  { %2086 = vtanh.f32 %v2560_v30 }
 0xfa0   :  { %2088 = vtanh.f32 %v2562_v33  ;;  %v1102_v13 = vpop.permute.xlu0 %1101 }
 0xfa1   :  { %v2567_v43 = vadd.f32 %v1102_v13, %v1094_v42 }
 0xfa3   :  { %2090 = vtanh.f32 %v2567_v43 }
 0xfac   :  { %v2087_v21 = vpop.eup %2086 }
 0xfad   :  { %v2089_v23 = vpop.eup %2088  ;;  %1164 = vrot.lane.b32.xlu1 %v2087_v21, %s2246_s30 }
 0xfae   :  { %1166 = vrot.lane.b32.xlu0 %v2089_v23, %s2246_s30 }
 0xfb0   :  { %v2091_v45 = vpop.eup %2090 }
 0xfb1   :  { %1107 = vrot.lane.b32.xlu1 %v2091_v45, %s2246_s30 }
0x101f   :  { %v1165_v46 = vpop.permute.xlu1 %1164 }
0x1020   :  { %v1170_v29 = vmul.f32 %v2081_v15, %v1165_v46  ;;  %v1167_v32 = vpop.permute.xlu0 %1166 }
0x1021   :  { %v1171_v48 = vmul.f32 %v2083_v17, %v1167_v32  ;;  %v1325_v32 = vrot.slane %v2562_v33, 7 }
0x1022   :  { %v1172_v49 = vpack.c.bf16 %v1170_v29, %v1170_v29  ;;  %v1324_v29 = vrot.slane %v2560_v30, 7 }
0x1023   :  { %v1173_v26 = vpack.c.bf16 %v1171_v48, %v1171_v48  ;;  %v1108_v51 = vpop.permute.xlu1 %1107 }
0x1024   :  { %v1176_v50 = vunpack.c.l.b16 %v1172_v49  ;;  %v1110_v53 = vmul.f32 %v2085_v20, %v1108_v51 }
0x1025   :  { %v1177_v52 = vunpack.c.l.b16 %v1173_v26 }
0x1026   :  { %v1178_v36 = vrot.slane %v1176_v50, 5  ;;  %v1228_v56 = vpack.c.bf16 %v1110_v53, %v1110_v53 }
0x1027   :  { %v1179_v54 = vrot.slane %v1177_v52, 4 }
0x1028   :  { %1230 = vrot.lane.b32.xlu1 %v1228_v56, %s2254_s0 }
0x1029   :  { %v1180_v58 = vsel %vm202_vm3, %v1179_v54, %v1178_v36 }
0x102a   :  { %v1181_v59 = vpack.c.b16 %v1180_v58, %v1180_v58 }
0x102c   :  { %1182 = vrot.lane.b32.xlu0 %v1181_v59, %s2254_s0 }
0x109a   :  { %v1231_v40 = vpop.permute.xlu1 %1230 }
0x109b   :  { %1907 = vmatmul.mubr.msk.bf16.vlgmr.msra.gmra.mxu0 %vm227_vm4, %v1231_v40 }
0x109c   :  { %1911 = vmatpush3.bf16.msra.mxu0 %v2577_v44  ;;  %1914 = vmatprep.mubr.msk.bf16.mxu0 %vm2253_vm0, %v2252_v0 }
0x109d   :  { %1912 = vmatprep.subr.bf16.mxu0 %v2252_v0 }
0x109e   :  { %v1183_v35 = vpop.permute.xlu0 %1182 }
0x109f   :  { %1809 = vmatmul.mubr.msk.bf16.vlgmr.msra.gmra.mxu1 %vm227_vm4, %v1183_v35 }
0x10a0   :  { %1390 = vmatpush1.bf16.msra.mxu1 %v2584_v61  ;;  %1409 = vmatprep.mubr.bf16.mxu1 %v2255_v38 }
0x10a1   :  { %1913 = vmatpush3.bf16.msra.mxu0 %v2588_v39  ;;  %1391 = vmatprep.subr.bf16.mxu1 %v2591_v62 }
0x10a2   :  { %1918 = vmatprep.subr.bf16.mxu0 %v2252_v0 }
0x10a4   :  { %1392 = vmatpush1.bf16.msra.mxu1 %v2595_v37 }
0x10a5   :  { %1579 = vmatprep.subr.bf16.mxu1 %v2157_v41 }
0x115b   :  { %v1269_v1 = vpop.f32.mrf.mxu0 }
0x115d   :  { %v1908_v34 = vpop.f32.mrf.mxu0 }
0x115f   :  { %v1221_v2 = vpop.f32.mrf.mxu1  ;;  %v1272_v47 = vpop.f32.mrf.mxu0 }
0x1160   :  { %v1302_v3 = vrot.slane %v1221_v2, 2  ;;  %v1303_v4 = vrot.slane %v1221_v2, 3 }
0x1161   :  { %v1223_v5 = vpop.f32.mrf.mxu1  ;;  %v1909_v55 = vpop.f32.mrf.mxu0 }
0x1162   :  { %v1306_v7 = vadd.f32 %v1302_v3, %v2333_v12  ;;  %v1307_v9 = vadd.f32 %v1303_v4, %v2331_v10  ;;  %v1275_v11 = vadd.f32 %v1269_v1, %v1223_v5 }
0x1163   :  { %v1225_v57 = vpop.f32.mrf.mxu1 }
0x1164   :  { %2092 = vtanh.f32 %v1306_v7  ;;  %v1276_v14 = vadd.f32 %v2390_v63, %v1275_v11  ;;  %v1812_v19 = vmul.f32 -1.442695, %v1306_v7  ;;  %v1813_v60 = vmul.f32 -1.442695, %v1307_v9 }
0x1165   :  { %2094 = vtanh.f32 %v1307_v9  ;;  %v1226_v15 = vpop.f32.mrf.mxu1 }
0x1166   :  { %2096 = vtanh.f32 %v1276_v14  ;;  %v1811_v20 = vmul.f32 -1.442695, %v1276_v14 }
0x1167   :  { %2098 = vpow2.f32 %v1812_v19 }
0x1168   :  { %2100 = vpow2.f32 %v1813_v60 }
0x1169   :  { %2102 = vpow2.f32 %v1811_v20 }
0x1171   :  { %v2093_v16 = vpop.eup %2092 }
0x1172   :  { %v2095_v17 = vpop.eup %2094  ;;  %1332 = vrot.lane.b32.xlu0 %v2093_v16, %s2246_s30 }
0x1173   :  { %1334 = vrot.lane.b32.xlu1 %v2095_v17, %s2246_s30  ;;  %v2097_v18 = vpop.eup %2096 }
0x1174   :  { %v2099_v22 = vpop.eup %2098 }
0x1175   :  { %v2101_v24 = vpop.eup %2100  ;;  %v1314_v63 = vadd.f32 1.0, %v2099_v22 }
0x1176   :  { %1286 = vrot.lane.b32.xlu0 %v2097_v18, %s2246_s30  ;;  %v1315_v25 = vadd.f32 1.0, %v2101_v24  ;;  %v2103_v6 = vpop.eup %2102 }
0x1177   :  { %2104 = vrcp.f32 %v1314_v63  ;;  %v1280_v8 = vadd.f32 1.0, %v2103_v6 }
0x1178   :  { %2106 = vrcp.f32 %v1315_v25 }
0x1179   :  { %2108 = vrcp.f32 %v1280_v8 }
0x1184   :  { %v2105_v27 = vpop.eup %2104 }
0x1185   :  { %v2107_v31 = vpop.eup %2106  ;;  %v1328_v48 = vmul.f32 %v2105_v27, %v1324_v29 }
0x1186   :  { %v2109_v23 = vpop.eup %2108  ;;  %v1329_v26 = vmul.f32 %v2107_v31, %v1325_v32 }
0x1187   :  { %v1284_v53 = vmul.f32 %v2109_v23, %v2567_v43 }
0x11e4   :  { %v1333_v28 = vpop.permute.xlu0 %1332 }
0x11e5   :  { %v1338_v42 = vmul.f32 %v2105_v27, %v1333_v28  ;;  %v1335_v13 = vpop.permute.xlu1 %1334 }
0x11e6   :  { %v1339_v21 = vmul.f32 %v2107_v31, %v1335_v13 }
0x11e7   :  { %1342 = vrot.lane.b32.xlu1 %v1338_v42, %s2254_s0 }
0x11e8   :  { %1344 = vrot.lane.b32.xlu0 %v1339_v21, %s2254_s0  ;;  %v1287_v45 = vpop.permute.xlu0 %1286 }
0x11e9   :  { %v1289_v46 = vmul.f32 %v2109_v23, %v1287_v45 }
0x11eb   :  { %1291 = vrot.lane.b32.xlu1 %v1289_v46, %s2254_s0 }
0x1259   :  { %v1343_v49 = vpop.permute.xlu1 %1342 }
0x125a   :  { %v2609_v50 = vadd.f32 %v1343_v49, %v1328_v48  ;;  %v1345_v51 = vpop.permute.xlu0 %1344 }
0x125b   :  { %v2611_v52 = vadd.f32 %v1345_v51, %v1329_v26 }
0x125c   :  { %2110 = vtanh.f32 %v2609_v50  ;;  %v1514_v26 = vrot.slane %v2609_v50, 7 }
0x125d   :  { %2112 = vtanh.f32 %v2611_v52  ;;  %v1292_v36 = vpop.permute.xlu1 %1291  ;;  %v1515_v51 = vrot.slane %v2611_v52, 7 }
0x125e   :  { %v2616_v54 = vadd.f32 %v1292_v36, %v1284_v53 }
0x1260   :  { %2114 = vtanh.f32 %v2616_v54 }
0x1269   :  { %v2111_v30 = vpop.eup %2110 }
0x126a   :  { %v2113_v33 = vpop.eup %2112  ;;  %1354 = vrot.lane.b32.xlu0 %v2111_v30, %s2246_s30 }
0x126b   :  { %1356 = vrot.lane.b32.xlu1 %v2113_v33, %s2246_s30 }
0x126d   :  { %v2115_v56 = vpop.eup %2114 }
0x126e   :  { %1297 = vrot.lane.b32.xlu0 %v2115_v56, %s2246_s30 }
0x12dc   :  { %v1355_v58 = vpop.permute.xlu0 %1354 }
0x12dd   :  { %v1360_v59 = vmul.f32 %v2105_v27, %v1355_v58  ;;  %v1357_v40 = vpop.permute.xlu1 %1356 }
0x12de   :  { %v1361_v35 = vmul.f32 %v2107_v31, %v1357_v40 }
0x12df   :  { %v1362_v41 = vpack.c.bf16 %v1360_v59, %v1360_v59 }
0x12e0   :  { %v1363_v43 = vpack.c.bf16 %v1361_v35, %v1361_v35  ;;  %v1298_v34 = vpop.permute.xlu0 %1297 }
0x12e1   :  { %v1366_v1 = vunpack.c.l.b16 %v1362_v41  ;;  %v1300_v3 = vmul.f32 %v2109_v23, %v1298_v34 }
0x12e2   :  { %v1367_v2 = vunpack.c.l.b16 %v1363_v43 }
0x12e3   :  { %v1368_v4 = vrot.slane %v1366_v1, 6  ;;  %v1418_v5 = vpack.c.bf16 %v1300_v3, %v1300_v3 }
0x12e4   :  { %v1369_v47 = vrot.slane %v1367_v2, 5 }
0x12e5   :  { %1420 = vrot.lane.b32.xlu0 %v1418_v5, %s2254_s0 }
0x12e6   :  { %v1370_v7 = vsel %vm202_vm3, %v1369_v47, %v1368_v4 }
0x12e7   :  { %v1371_v9 = vpack.c.b16 %v1370_v7, %v1370_v7 }
0x12e9   :  { %1372 = vrot.lane.b32.xlu1 %v1371_v9, %s2254_s0 }
0x1357   :  { %v1421_v11 = vpop.permute.xlu0 %1420 }
0x1358   :  { %1915 = vmatmul.mubr.msk.bf16.vlgmr.msra.gmra.mxu0 %vm227_vm4, %v1421_v11 }
0x1359   :  { %1919 = vmatpush3.bf16.msra.mxu0 %v2577_v44  ;;  %1922 = vmatprep.mubr.msk.bf16.mxu0 %vm2253_vm0, %v2252_v0 }
0x135a   :  { %1920 = vmatprep.subr.bf16.mxu0 %v2252_v0 }
0x135b   :  { %v1373_v55 = vpop.permute.xlu1 %1372 }
0x135c   :  { %1814 = vmatmul.mubr.msk.bf16.vlgmr.msra.gmra.mxu1 %vm227_vm4, %v1373_v55 }
0x135d   :  { %1580 = vmatpush1.bf16.msra.mxu1 %v2584_v61  ;;  %1599 = vmatprep.mubr.bf16.mxu1 %v2255_v38 }
0x135e   :  { %1921 = vmatpush3.bf16.msra.mxu0 %v2588_v39  ;;  %1581 = vmatprep.subr.bf16.mxu1 %v2591_v62  ;;  %v2639_v62 = vld [vmem:[#allocation7] ss:$0 sm:$0xff] }
0x1361   :  { %1582 = vmatpush1.bf16.msra.mxu1 %v2595_v37 }
0x1362   :  { %1926 = vmatprep.subr.bf16.mxu1 %v2252_v0 }
0x1418   :  { %v1459_v44 = vpop.f32.mrf.mxu0 }
0x141a   :  { %v1916_v57 = vpop.f32.mrf.mxu0 }
0x141c   :  { %v1411_v14 = vpop.f32.mrf.mxu1  ;;  %v1462_v17 = vpop.f32.mrf.mxu0 }
0x141d   :  { %v1492_v15 = vrot.slane %v1411_v14, 1  ;;  %v1493_v16 = vrot.slane %v1411_v14, 2 }
0x141e   :  { %v1413_v18 = vpop.f32.mrf.mxu1  ;;  %v1917_v60 = vpop.f32.mrf.mxu0 }
0x141f   :  { %v1496_v19 = vadd.f32 %v1492_v15, %v2333_v12  ;;  %v1497_v61 = vadd.f32 %v1493_v16, %v2331_v10  ;;  %v1465_v38 = vadd.f32 %v1459_v44, %v1413_v18 }
0x1420   :  { %v1415_v39 = vpop.f32.mrf.mxu1 }
0x1421   :  { %2116 = vtanh.f32 %v1496_v19  ;;  %v1466_v37 = vadd.f32 %v2639_v62, %v1465_v38  ;;  %v1817_v10 = vmul.f32 -1.442695, %v1496_v19  ;;  %v1818_v63 = vmul.f32 -1.442695, %v1497_v61 }
0x1422   :  { %2118 = vtanh.f32 %v1497_v61  ;;  %v1416_v20 = vpop.f32.mrf.mxu1 }
0x1423   :  { %2120 = vtanh.f32 %v1466_v37  ;;  %v1816_v25 = vmul.f32 -1.442695, %v1466_v37 }
0x1424   :  { %2122 = vpow2.f32 %v1817_v10 }
0x1425   :  { %2124 = vpow2.f32 %v1818_v63 }
0x1426   :  { %2126 = vpow2.f32 %v1816_v25 }
0x142e   :  { %v2117_v22 = vpop.eup %2116 }
0x142f   :  { %v2119_v24 = vpop.eup %2118  ;;  %1522 = vrot.lane.b32.xlu1 %v2117_v22, %s2246_s30 }
0x1430   :  { %1524 = vrot.lane.b32.xlu0 %v2119_v24, %s2246_s30  ;;  %v2121_v12 = vpop.eup %2120 }
0x1431   :  { %v2123_v6 = vpop.eup %2122 }
0x1432   :  { %v2125_v8 = vpop.eup %2124  ;;  %v1504_v27 = vadd.f32 1.0, %v2123_v6 }
0x1433   :  { %1476 = vrot.lane.b32.xlu1 %v2121_v12, %s2246_s30  ;;  %v1505_v28 = vadd.f32 1.0, %v2125_v8  ;;  %v2127_v31 = vpop.eup %2126 }
0x1434   :  { %2128 = vrcp.f32 %v1504_v27  ;;  %v1470_v42 = vadd.f32 1.0, %v2127_v31  ;;  %v1955_v31 = vld [vmem:[%s2686_s6] sm:$0xff]  }
0x1435   :  { %2130 = vrcp.f32 %v1505_v28 }
0x1436   :  { %2132 = vrcp.f32 %v1470_v42 }
0x1441   :  { %v2129_v13 = vpop.eup %2128 }
0x1442   :  { %v2131_v23 = vpop.eup %2130  ;;  %v1518_v53 = vmul.f32 %v2129_v13, %v1514_v26 }
0x1443   :  { %v2133_v32 = vpop.eup %2132  ;;  %v1519_v30 = vmul.f32 %v2131_v23, %v1515_v51 }
0x1444   :  { %v1474_v59 = vmul.f32 %v2133_v32, %v2616_v54 }
0x14a1   :  { %v1523_v21 = vpop.permute.xlu1 %1522 }
0x14a2   :  { %v1528_v45 = vmul.f32 %v2129_v13, %v1523_v21  ;;  %v1525_v46 = vpop.permute.xlu0 %1524 }
0x14a3   :  { %v1529_v29 = vmul.f32 %v2131_v23, %v1525_v46  ;;  %v1822_v46 = vld [vmem:[%s2687_s7] ss:$0 sm:$0xff] }
0x14a4   :  { %1532 = vrot.lane.b32.xlu0 %v1528_v45, %s2254_s0 }
0x14a5   :  { %1534 = vrot.lane.b32.xlu1 %v1529_v29, %s2254_s0  ;;  %v1477_v48 = vpop.permute.xlu1 %1476 }
0x14a6   :  { %v1479_v49 = vmul.f32 %v2133_v32, %v1477_v48 }
0x14a8   :  { %1481 = vrot.lane.b32.xlu0 %v1479_v49, %s2254_s0 }
0x1516   :  { %v1533_v36 = vpop.permute.xlu0 %1532 }
0x1517   :  { %v1538_v33 = vadd.f32 %v1533_v36, %v1518_v53  ;;  %v1535_v56 = vpop.permute.xlu1 %1534 }
0x1518   :  { %v1539_v58 = vadd.f32 %v1535_v56, %v1519_v30 }
0x1519   :  { %2134 = vtanh.f32 %v1538_v33 }
0x151a   :  { %2136 = vtanh.f32 %v1539_v58  ;;  %v1482_v40 = vpop.permute.xlu0 %1481 }
0x151b   :  { %v1484_v35 = vadd.f32 %v1482_v40, %v1474_v59 }
0x151d   :  { %2138 = vtanh.f32 %v1484_v35 }
0x1526   :  { %v2135_v41 = vpop.eup %2134 }
0x1527   :  { %v2137_v43 = vpop.eup %2136  ;;  %1544 = vrot.lane.b32.xlu1 %v2135_v41, %s2246_s30 }
0x1528   :  { %1546 = vrot.lane.b32.xlu0 %v2137_v43, %s2246_s30 }
0x152a   :  { %v2139_v50 = vpop.eup %2138 }
0x152b   :  { %1487 = vrot.lane.b32.xlu1 %v2139_v50, %s2246_s30 }
0x1599   :  { %v1545_v52 = vpop.permute.xlu1 %1544 }
0x159a   :  { %v1550_v1 = vmul.f32 %v2129_v13, %v1545_v52  ;;  %v1547_v34 = vpop.permute.xlu0 %1546 }
0x159b   :  { %v1551_v2 = vmul.f32 %v2131_v23, %v1547_v34 }
0x159c   :  { %v1552_v3 = vpack.c.bf16 %v1550_v1, %v1550_v1 }
0x159d   :  { %v1553_v4 = vpack.c.bf16 %v1551_v2, %v1551_v2  ;;  %v1488_v54 = vpop.permute.xlu1 %1487 }
0x159e   :  { %v1556_v47 = vunpack.c.l.b16 %v1552_v3  ;;  %v1490_v7 = vmul.f32 %v2133_v32, %v1488_v54 }
0x159f   :  { %v1557_v5 = vunpack.c.l.b16 %v1553_v4 }
0x15a0   :  { %v1558_v9 = vrot.slane %v1556_v47, 7  ;;  %v1607_v55 = vpack.c.bf16 %v1490_v7, %v1490_v7 }
0x15a1   :  { %v1559_v11 = vrot.slane %v1557_v5, 6 }
0x15a2   :  { %1609 = vrot.lane.b32.xlu1 %v1607_v55, %s2254_s0 }
0x15a3   :  { %v1560_v44 = vsel %vm202_vm3, %v1559_v11, %v1558_v9 }
0x15a4   :  { %v1561_v57 = vpack.c.b16 %v1560_v44, %v1560_v44 }
0x15a6   :  { %1562 = vrot.lane.b32.xlu0 %v1561_v57, %s2254_s0 }
0x1614   :  { %v1610_v14 = vpop.permute.xlu1 %1609 }
0x1615   :  { %1923 = vmatmul.mubr.msk.bf16.vlgmr.msra.gmra.mxu0 %vm227_vm4, %v1610_v14 }
0x1618   :  { %v1563_v15 = vpop.permute.xlu0 %1562 }
0x1619   :  { %1819 = vmatmul.mubr.msk.bf16.vlgmr.msra.gmra.mxu1 %vm227_vm4, %v1563_v15 }
0x161a   :  { %1930 = vmatprep.mubr.msk.bf16.mxu1 %vm2253_vm0, %v2252_v0 }
0x16d5   :  { %v1648_v16 = vpop.f32.mrf.mxu0 }
0x16d7   :  { %v1924_v17 = vpop.f32.mrf.mxu0 }
0x16d9   :  { %v1601_v18 = vpop.f32.mrf.mxu1  ;;  %v1651_v19 = vpop.f32.mrf.mxu0 }
0x16db   :  { %v1602_v61 = vpop.f32.mrf.mxu1  ;;  %v1925_v60 = vpop.f32.mrf.mxu0 }
0x16dc   :  { %v1654_v38 = vadd.f32 %v1648_v16, %v1602_v61 }
0x16dd   :  { %v1604_v39 = vpop.f32.mrf.mxu1 }
0x16de   :  { %v1655_v37 = vadd.f32 %v2639_v62, %v1654_v38  ;;  %v1954_v62 = vld [vmem:[%s2686_s6 + $0x8] sm:$0xff]   ;;  %s2256_s6 = smov [#allocation8]  }
0x16df   :  { %v1605_v20 = vpop.f32.mrf.mxu1  ;;  %1927 = vmatpush3.bf16.msra.mxu1 %v1954_v62 }
0x16e0   :  { %2140 = vtanh.f32 %v1655_v37  ;;  %v1821_v24 = vmul.f32 -1.442695, %v1655_v37  ;;  %1928 = vmatprep.subr.bf16.mxu1 %v2252_v0 }
0x16e2   :  { %2142 = vpow2.f32 %v1821_v24 }
0x16e3   :  { %1929 = vmatpush3.bf16.msra.mxu1 %v1955_v31 }
0x16ed   :  { %v2141_v22 = vpop.eup %2140 }
0x16ee   :  { %1665 = vrot.lane.b32.xlu0 %v2141_v22, %s2246_s30 }
0x16ef   :  { %v2143_v12 = vpop.eup %2142 }
0x16f0   :  { %v1659_v10 = vadd.f32 1.0, %v2143_v12 }
0x16f2   :  { %2144 = vrcp.f32 %v1659_v10 }
0x16ff   :  { %v2145_v63 = vpop.eup %2144 }
0x1700   :  { %v1663_v8 = vmul.f32 %v2145_v63, %v1484_v35 }
0x1760   :  { %v1666_v25 = vpop.permute.xlu0 %1665 }
0x1761   :  { %v1668_v6 = vmul.f32 %v2145_v63, %v1666_v25 }
0x1763   :  { %1670 = vrot.lane.b32.xlu1 %v1668_v6, %s2254_s0 }
0x17d5   :  { %v1671_v27 = vpop.permute.xlu1 %1670 }
0x17d6   :  { %v1673_v28 = vadd.f32 %v1671_v27, %v1663_v8 }
0x17d8   :  { %2146 = vtanh.f32 %v1673_v28 }
0x17e5   :  { %v2147_v42 = vpop.eup %2146 }
0x17e6   :  { %1676 = vrot.lane.b32.xlu0 %v2147_v42, %s2246_s30  ;;  %s1764_s30 = sshll.u32 %s2256_s6, 4  ;;  %s1765_s30 = int_to_ptr.vmem [resolvable:$true] %s1764_s30 }
0x17e7   :  { %s2219_s13 = scalar_lea.vmem %s1765_s30, 32  ;;  %p2224_p2 = scmp.lt.s32.totalorder %s1765_s30, %s1765_s30 }
0x17e8   :  { %p2220_p1 = scmp.ne.s32.totalorder %s1765_s30, %s2219_s13  ;;  %p2225_p3 = scmp.lt.s32.totalorder %s2219_s13, %s2219_s13 }
0x17ea   :  { %p2226_p4 = por %p2225_p3, %p2224_p2 }
0x17ec   :  { %p2227_p5 = pnand %p2226_p4, %p2220_p1 }
0x1858   :  { %v1677_v13 = vpop.permute.xlu0 %1676 }
0x1859   :  { %v1679_v21 = vmul.f32 %v2145_v63, %v1677_v13 }
0x185b   :  { %v1680_v23 = vpack.c.bf16 %v1679_v21, %v1679_v21 }
0x185d   :  { %1693 = vrot.lane.b32.xlu1 %v1680_v23, %s2254_s0 }
0x18cf   :  { %v1694_v45 = vpop.permute.xlu1 %1693 }
0x18d0   :  { %1931 = vmatmul.mubr.msk.bf16.vlgmr.msra.gmra.mxu1 %vm227_vm4, %v1694_v45 }
0x1990   :  { %v1744_v29 = vpop.f32.mrf.mxu1 }
0x1991   :  { %v1745_v32 = vadd.f32 %v1822_v46, %v1744_v29 }
0x1992   :  { %v1932_v48 = vpop.f32.mrf.mxu1 }
0x1993   :  { %v1826_v0 = vmul.f32 -1.442695, %v1745_v32 }
0x1994   :  { %v1747_v49 = vpop.f32.mrf.mxu1 }
0x1995   :  { %2148 = vpow2.f32 %v1826_v0 }
0x1996   :  { %v1933_v26 = vpop.f32.mrf.mxu1 }
0x19a2   :  { %v2149_v51 = vpop.eup %2148 }
0x19a3   :  { %v1753_v53 = vadd.f32 1.0, %v2149_v51 }
0x19a5   :  { %2150 = vrcp.f32 %v1753_v53 }
0x19b2   :  { %v2151_v36 = vpop.eup %2150 }
0x19b3   :  { %1757 = vst.msk [vmem:[#allocation8] sm:$0x3] %vm1756_vm5, %v2151_v36 }
0x19b4   :  { %2230 = shalt.err (!%p2227_p5)
}
0x19b5   :  { %1767 = dma.vmem_to_hbm [thread:$0]  %s1765_s30, 32, %s2688_s8, [#allocation4]  }
0x19b6   :  { %2243 = dma.done.wait [#allocation4], 32  }
0x19b7   :  { %2244 = vsyncadd [#allocation4], 4294967264 }
0x19b8   :  { %1771 = vsyncpa [#allocation3], 1 }
0x19b9   :  { %1772 = vsyncpa [#allocation6], 1 }
0x19ba   :  { %1773 = vsyncpa [#allocation4], 1 }

</bundles_post_ra>
